<compile_context>
chip_gen: v6e
topology: v6e:2x2x1
jax: 0.10.0
libtpu: 0.0.40
codegen_flags: <defaults>
</compile_context>

<pallas_src>
import jax
import jax.numpy as jnp
from jax.experimental import pallas as pl
from jax.experimental.pallas import tpu as pltpu


def _round_up(x, m):
    return (x + m - 1) // m * m


def swiglu_kernel(x_ref, wg_ref, w1_ref, b01_ref, w2_ref, b2_ref, o_ref, acc_ref):
    """out = (silu(x@Wg + bg) * (x@W1 + b1)) @ W2 + b2, hidden axis tiled."""
    h = pl.program_id(1)

    @pl.when(h == 0)
    def _init():
        acc_ref[...] = jnp.zeros_like(acc_ref)

    x = x_ref[...]                                   # (tm, d_model), bf16
    b = b01_ref[...].astype(jnp.float32)             # (2, th)
    bg = b[0:1, :]
    b1 = b[1:2, :]

    # Two (tm, d) @ (d, th) MXU matmuls with f32 accumulation.
    g = jnp.dot(x, wg_ref[...], preferred_element_type=jnp.float32) + bg
    swish = g * jax.nn.sigmoid(g)                    # SiLU in f32 (EUP exp slot)
    lin = jnp.dot(x, w1_ref[...], preferred_element_type=jnp.float32) + b1
    gated = (swish * lin).astype(w2_ref.dtype)       # back to MXU input dtype

    # Partial contribution of this hidden slab: (tm, th) @ (th, d_model).
    acc_ref[...] += jnp.dot(gated, w2_ref[...], preferred_element_type=jnp.float32)

    @pl.when(h == pl.num_programs(1) - 1)
    def _finalize():
        out = acc_ref[...] + b2_ref[...].astype(jnp.float32)
        o_ref[...] = out.astype(o_ref.dtype)


def _choose_tiles(m_pad, d_model, h_pad, weight_bytes):
    # Row tile: feed the MXU >=128 rows; keep >=2 M-steps when possible so the
    # parallel axis can shard across both v7x TensorCores; cap at 256.
    if m_pad >= 512:
        tm = 256
    elif m_pad >= 256:
        tm = 128
    else:
        tm = m_pad
    # Hidden tile: biggest multiple of 128 in {512, 384, 256, 128} dividing
    # H_pad while the double-buffered weight slabs (two (d, th) + one (th, d))
    # stay under ~24 MiB so everything fits even on 64 MiB v7x VMEM.
    budget = 24 * 1024 * 1024
    th = 128
    for cand in (512, 384, 256):
        if h_pad % cand == 0 and 6 * d_model * cand * weight_bytes <= budget:
            th = cand
            break
    return tm, min(th, h_pad)


def swiglu_pallas(x2d, wg, bg, w1, b1, w2, b2, *, out_dtype=None):
    """x2d: (M, d_model); wg/w1: (d_model, H); w2: (H, d_model); biases (1, .).

    H is expected to be a multiple of 128 (the module pads it).  M may be
    ragged; it is zero-padded to the row tile and sliced back afterwards.
    """
    M, d_model = x2d.shape
    hidden = wg.shape[1]
    out_dtype = out_dtype or x2d.dtype
    wbytes = jnp.dtype(wg.dtype).itemsize

    tm, th = _choose_tiles(_round_up(M, 8), d_model, hidden, wbytes)
    m_pad = _round_up(M, tm)
    if m_pad != M:
        x2d = jnp.pad(x2d, ((0, m_pad - M), (0, 0)))

    grid = (m_pad // tm, hidden // th)

    # Stack the two hidden-sized biases into one (2, H) input (fewer buffers;
    # each would otherwise be sublane-padded to 8 rows on its own).
    b01 = jnp.concatenate([bg, b1], axis=0)

    # Rough VMEM requirement (double-buffered I/O tiles + f32 accumulator),
    # clamped to [32 MiB, 64 MiB] so it is legal on every generation (v7x has
    # only 64 MiB physical per TensorCore).
    xbytes = jnp.dtype(x2d.dtype).itemsize
    obytes = jnp.dtype(out_dtype).itemsize
    need = (tm * d_model * xbytes
            + 2 * d_model * th * wbytes
            + 2 * th * wbytes
            + th * d_model * wbytes
            + d_model * wbytes
            + tm * d_model * obytes) * 2
    need += tm * d_model * 4
    vmem_limit = int(min(max(2 * need, 32 * 1024 * 1024), 64 * 1024 * 1024))

    out = pl.pallas_call(
        swiglu_kernel,
        out_shape=jax.ShapeDtypeStruct((m_pad, d_model), out_dtype),
        grid=grid,
        in_specs=[
            pl.BlockSpec((tm, d_model), lambda i, h: (i, 0)),   # X rows (resident over h)
            pl.BlockSpec((d_model, th), lambda i, h: (0, h)),   # Wg slab
            pl.BlockSpec((d_model, th), lambda i, h: (0, h)),   # W1 slab
            pl.BlockSpec((2, th),       lambda i, h: (0, h)),   # [bg; b1] slab
            pl.BlockSpec((th, d_model), lambda i, h: (h, 0)),   # W2 slab
            pl.BlockSpec((1, d_model),  lambda i, h: (0, 0)),   # b2
        ],
        out_specs=pl.BlockSpec((tm, d_model), lambda i, h: (i, 0)),
        scratch_shapes=[pltpu.VMEM((tm, d_model), jnp.float32)],
        compiler_params=pltpu.CompilerParams(
            dimension_semantics=("parallel", "arbitrary"),
            vmem_limit_bytes=vmem_limit,
        ),
    )(x2d, wg, w1, b01, w2, b2)

    return out[:M] if m_pad != M else out


class SwiGLUPallas:
    """JAX/Pallas re-implementation of the PyTorch SwiGLU module."""

    def __init__(self, d_model, expansion_factor=8 / 3,
                 param_dtype=jnp.bfloat16, key=None):
        hidden_dim = int(expansion_factor * d_model)
        h_pad = _round_up(hidden_dim, 128)          # lane-dense hidden dim
        self.d_model = d_model
        self.hidden_dim = hidden_dim
        self.hidden_pad = h_pad
        self.compute_dtype = param_dtype

        if key is None:
            key = jax.random.PRNGKey(0)
        k = jax.random.split(key, 6)

        def uinit(kk, shape, fan_in):
            bound = 1.0 / (fan_in ** 0.5)
            return jax.random.uniform(kk, shape, jnp.float32, -bound, bound)

        # Stored as (in_features, out_features), i.e. already transposed.
        wg = uinit(k[0], (d_model, hidden_dim), d_model)
        bg = uinit(k[1], (1, hidden_dim), d_model)
        w1 = uinit(k[2], (d_model, hidden_dim), d_model)
        b1 = uinit(k[3], (1, hidden_dim), d_model)
        w2 = uinit(k[4], (hidden_dim, d_model), hidden_dim)
        b2 = uinit(k[5], (1, d_model), hidden_dim)

        # Zero-pad hidden to a multiple of 128 (exact: padded gate columns give
        # silu(0) * 0 = 0, so padded W2 rows contribute nothing).
        pad_h = h_pad - hidden_dim
        self.wg = jnp.pad(wg, ((0, 0), (0, pad_h))).astype(param_dtype)
        self.bg = jnp.pad(bg, ((0, 0), (0, pad_h))).astype(param_dtype)
        self.w1 = jnp.pad(w1, ((0, 0), (0, pad_h))).astype(param_dtype)
        self.b1 = jnp.pad(b1, ((0, 0), (0, pad_h))).astype(param_dtype)
        self.w2 = jnp.pad(w2, ((0, pad_h), (0, 0))).astype(param_dtype)
        self.b2 = b2.astype(param_dtype)

    def __call__(self, x):
        # x: (..., d_model)
        orig_shape = x.shape
        x2d = x.reshape(-1, self.d_model).astype(self.compute_dtype)
        out = swiglu_pallas(x2d, self.wg, self.bg, self.w1, self.b1,
                            self.w2, self.b2, out_dtype=x.dtype)
        return out.reshape(orig_shape)


def swiglu_reference(x, m):
    """Pure-JAX f32 reference using the same (quantized, padded) parameters."""
    xf = x.reshape(-1, m.d_model).astype(m.compute_dtype).astype(jnp.float32)
    wg = m.wg.astype(jnp.float32); bg = m.bg.astype(jnp.float32)
    w1 = m.w1.astype(jnp.float32); b1 = m.b1.astype(jnp.float32)
    w2 = m.w2.astype(jnp.float32); b2 = m.b2.astype(jnp.float32)
    g = xf @ wg + bg
    s = g * jax.nn.sigmoid(g)
    lin = xf @ w1 + b1
    out = (s * lin) @ w2 + b2
    return out.astype(x.dtype).reshape(x.shape)


if __name__ == "__main__":
    key = jax.random.PRNGKey(0)
    k_in, k_param = jax.random.split(key)

    # Small but tile-friendly demo: M = 2*128 = 256 tokens -> tm=128 (2 row
    # steps, megacore-parallel), hidden = int(8/3*256) = 682 -> padded to 768,
    # th=384 (2 hidden/reduction steps).
    batch, seq, d_model = 2, 128, 256
    x = jax.random.normal(k_in, (batch, seq, d_model), jnp.float32)

    mod = SwiGLUPallas(d_model, key=k_param)

    out = jax.block_until_ready(mod(x))
    ref = swiglu_reference(x, mod)

    assert out.shape == (batch, seq, d_model)
    max_err = float(jnp.max(jnp.abs(out - ref)))
    assert jnp.allclose(out, ref, atol=5e-2, rtol=5e-2), \
        f"mismatch vs reference (max abs err {max_err})"

    print("KERNEL_OK")
</pallas_src>

<mosaic_0001>
module attributes {stable_mosaic.version = 11 : i64} {
  func.func @swiglu_kernel(%arg0: i32, %arg1: i32, %arg2: memref<128x256xbf16, #tpu.memory_space<vmem>>, %arg3: memref<256x384xbf16, #tpu.memory_space<vmem>>, %arg4: memref<256x384xbf16, #tpu.memory_space<vmem>>, %arg5: memref<2x384xbf16, #tpu.memory_space<vmem>>, %arg6: memref<384x256xbf16, #tpu.memory_space<vmem>>, %arg7: memref<1x256xbf16, #tpu.memory_space<vmem>>, %arg8: memref<128x256xf32, #tpu.memory_space<vmem>>, %arg9: memref<128x256xf32, #tpu.memory_space<vmem>>) attributes {dimension_semantics = [#tpu.dimension_semantics<parallel>, #tpu.dimension_semantics<arbitrary>], iteration_bounds = array<i64: 2, 2>, scalar_prefetch = 0 : i64, scratch_operands = 1 : i64, tpu.core_type = #tpu.core_type<tc>, window_params = [{transform_indices = @transform_0, window_bounds = array<i64: 128, 256>}, {transform_indices = @transform_1, window_bounds = array<i64: 256, 384>}, {transform_indices = @transform_2, window_bounds = array<i64: 256, 384>}, {transform_indices = @transform_3, window_bounds = array<i64: 2, 384>}, {transform_indices = @transform_4, window_bounds = array<i64: 384, 256>}, {pipeline_mode = #tpu.pipeline_mode<synchronous>, transform_indices = @transform_5, window_bounds = array<i64: 1, 256>}, {transform_indices = @transform_6, window_bounds = array<i64: 128, 256>}]} {
    %c0_i32 = arith.constant 0 : i32
    %0 = arith.cmpi eq, %arg1, %c0_i32 : i32
    %1 = arith.extui %0 : i1 to i32
    %c0_i32_0 = arith.constant 0 : i32
    %2 = arith.cmpi ne, %1, %c0_i32_0 : i32
    scf.if %2 {
      %cst_18 = arith.constant 0.000000e+00 : f32
      %32 = vector.broadcast %cst_18 : f32 to vector<128x256xf32>
      %c0_19 = arith.constant 0 : index
      %c0_20 = arith.constant 0 : index
      %33 = vector.load %arg9[%c0_19, %c0_20] : memref<128x256xf32, #tpu.memory_space<vmem>>, vector<128x256xf32>
      tpu.vector_store %arg9[%c0_19, %c0_20], %32 {strides = array<i32>} : memref<128x256xf32, #tpu.memory_space<vmem>>, vector<128x256xf32>,
    } else {
    }
    %c0 = arith.constant 0 : index
    %c0_1 = arith.constant 0 : index
    %3 = vector.load %arg2[%c0, %c0_1] : memref<128x256xbf16, #tpu.memory_space<vmem>>, vector<128x256xbf16>
    %c0_2 = arith.constant 0 : index
    %c0_3 = arith.constant 0 : index
    %4 = vector.load %arg5[%c0_2, %c0_3] : memref<2x384xbf16, #tpu.memory_space<vmem>>, vector<2x384xbf16>
    %5 = arith.extf %4 : vector<2x384xbf16> to vector<2x384xf32>
    %6 = vector.extract_strided_slice %5 {offsets = [0, 0], sizes = [1, 384], strides = [1, 1]} : vector<2x384xf32> to vector<1x384xf32>
    %7 = vector.extract_strided_slice %5 {offsets = [1, 0], sizes = [1, 384], strides = [1, 1]} : vector<2x384xf32> to vector<1x384xf32>
    %c0_4 = arith.constant 0 : index
    %c0_5 = arith.constant 0 : index
    %8 = vector.load %arg3[%c0_4, %c0_5] : memref<256x384xbf16, #tpu.memory_space<vmem>>, vector<256x384xbf16>
    %cst = arith.constant dense<0.000000e+00> : vector<128x384xf32>
    %9 = tpu.matmul %3, %8, %cst {dimension_numbers = #tpu.dot_dimension_numbers<[1], [0], [0], [1], [0, 0, 1, 1], [], []>} : vector<128x256xbf16>, vector<256x384xbf16>, vector<128x384xf32> -> vector<128x384xf32>
    %10 = vector.broadcast %6 : vector<1x384xf32> to vector<128x384xf32>
    %11 = arith.addf %9, %10 : vector<128x384xf32>
    %12 = arith.negf %11 : vector<128x384xf32>
    %13 = math.exp %12 : vector<128x384xf32>
    %cst_6 = arith.constant 1.000000e+00 : f32
    %14 = vector.broadcast %cst_6 : f32 to vector<128x384xf32>
    %15 = arith.addf %14, %13 : vector<128x384xf32>
    %16 = arith.divf %14, %15 : vector<128x384xf32>
    %17 = arith.mulf %11, %16 : vector<128x384xf32>
    %c0_7 = arith.constant 0 : index
    %c0_8 = arith.constant 0 : index
    %18 = vector.load %arg4[%c0_7, %c0_8] : memref<256x384xbf16, #tpu.memory_space<vmem>>, vector<256x384xbf16>
    %cst_9 = arith.constant dense<0.000000e+00> : vector<128x384xf32>
    %19 = tpu.matmul %3, %18, %cst_9 {dimension_numbers = #tpu.dot_dimension_numbers<[1], [0], [0], [1], [0, 0, 1, 1], [], []>} : vector<128x256xbf16>, vector<256x384xbf16>, vector<128x384xf32> -> vector<128x384xf32>
    %20 = vector.broadcast %7 : vector<1x384xf32> to vector<128x384xf32>
    %21 = arith.addf %19, %20 : vector<128x384xf32>
    %22 = arith.mulf %17, %21 : vector<128x384xf32>
    %23 = arith.truncf %22 : vector<128x384xf32> to vector<128x384xbf16>
    %c0_10 = arith.constant 0 : index
    %c0_11 = arith.constant 0 : index
    %24 = vector.load %arg9[%c0_10, %c0_11] : memref<128x256xf32, #tpu.memory_space<vmem>>, vector<128x256xf32>
    %c0_12 = arith.constant 0 : index
    %c0_13 = arith.constant 0 : index
    %25 = vector.load %arg6[%c0_12, %c0_13] : memref<384x256xbf16, #tpu.memory_space<vmem>>, vector<384x256xbf16>
    %cst_14 = arith.constant dense<0.000000e+00> : vector<128x256xf32>
    %26 = tpu.matmul %23, %25, %cst_14 {dimension_numbers = #tpu.dot_dimension_numbers<[1], [0], [0], [1], [0, 0, 1, 1], [], []>} : vector<128x384xbf16>, vector<384x256xbf16>, vector<128x256xf32> -> vector<128x256xf32>
    %27 = arith.addf %24, %26 : vector<128x256xf32>
    %c0_15 = arith.constant 0 : index
    %c0_16 = arith.constant 0 : index
    %28 = vector.load %arg9[%c0_15, %c0_16] : memref<128x256xf32, #tpu.memory_space<vmem>>, vector<128x256xf32>
    tpu.vector_store %arg9[%c0_15, %c0_16], %27 {strides = array<i32>} : memref<128x256xf32, #tpu.memory_space<vmem>>, vector<128x256xf32>,
    %c1_i32 = arith.constant 1 : i32
    %29 = arith.cmpi eq, %arg1, %c1_i32 : i32
    %30 = arith.extui %29 : i1 to i32
    %c0_i32_17 = arith.constant 0 : i32
    %31 = arith.cmpi ne, %30, %c0_i32_17 : i32
    scf.if %31 {
      %c0_18 = arith.constant 0 : index
      %c0_19 = arith.constant 0 : index
      %32 = vector.load %arg9[%c0_18, %c0_19] : memref<128x256xf32, #tpu.memory_space<vmem>>, vector<128x256xf32>
      %c0_20 = arith.constant 0 : index
      %c0_21 = arith.constant 0 : index
      %33 = vector.load %arg7[%c0_20, %c0_21] : memref<1x256xbf16, #tpu.memory_space<vmem>>, vector<1x256xbf16>
      %34 = arith.extf %33 : vector<1x256xbf16> to vector<1x256xf32>
      %35 = vector.broadcast %34 : vector<1x256xf32> to vector<128x256xf32>
      %36 = arith.addf %32, %35 : vector<128x256xf32>
      %c0_22 = arith.constant 0 : index
      %c0_23 = arith.constant 0 : index
      %37 = vector.load %arg8[%c0_22, %c0_23] : memref<128x256xf32, #tpu.memory_space<vmem>>, vector<128x256xf32>
      tpu.vector_store %arg8[%c0_22, %c0_23], %36 {strides = array<i32>} : memref<128x256xf32, #tpu.memory_space<vmem>>, vector<128x256xf32>,
    } else {
    }
    return
  }
  func.func @transform_0(%arg0: i32, %arg1: i32) -> (i32, i32) {
    %c0_i32 = arith.constant 0 : i32
    %c0_i32_0 = arith.constant 0 : i32
    return %arg0, %c0_i32 : i32, i32
  }
  func.func @transform_1(%arg0: i32, %arg1: i32) -> (i32, i32) {
    %c0_i32 = arith.constant 0 : i32
    %c0_i32_0 = arith.constant 0 : i32
    return %c0_i32, %arg1 : i32, i32
  }
  func.func @transform_2(%arg0: i32, %arg1: i32) -> (i32, i32) {
    %c0_i32 = arith.constant 0 : i32
    %c0_i32_0 = arith.constant 0 : i32
    return %c0_i32, %arg1 : i32, i32
  }
  func.func @transform_3(%arg0: i32, %arg1: i32) -> (i32, i32) {
    %c0_i32 = arith.constant 0 : i32
    %c0_i32_0 = arith.constant 0 : i32
    return %c0_i32, %arg1 : i32, i32
  }
  func.func @transform_4(%arg0: i32, %arg1: i32) -> (i32, i32) {
    %c0_i32 = arith.constant 0 : i32
    %c0_i32_0 = arith.constant 0 : i32
    return %arg1, %c0_i32 : i32, i32
  }
  func.func @transform_5(%arg0: i32, %arg1: i32) -> (i32, i32) {
    %c0_i32 = arith.constant 0 : i32
    %c0_i32_0 = arith.constant 0 : i32
    %c0_i32_1 = arith.constant 0 : i32
    return %c0_i32, %c0_i32_0 : i32, i32
  }
  func.func @transform_6(%arg0: i32, %arg1: i32) -> (i32, i32) {
    %c0_i32 = arith.constant 0 : i32
    %c0_i32_0 = arith.constant 0 : i32
    return %arg0, %c0_i32 : i32, i32
  }
}

</mosaic_0001>

<bundles_post_ra>
// kernel: tpu_custom_call.1
= control target key start
LH: loop header
LB: loop body
LE: loop exit
PB: predicated region body
PF: predicated region fallthrough
CT: control target
= control target key end

     0   :  { %s5530_s0 = inlined_call_operand.hbm [shape: bf16[256,256], index: 0, kind: input, shape index: {}]   ;;  %s5531_s1 = inlined_call_operand.hbm [shape: bf16[256,768], index: 1, kind: input, shape index: {}]   ;;  %s5532_s2 = inlined_call_operand.hbm [shape: bf16[256,768], index: 2, kind: input, shape index: {}]   ;;  %s5533_s3 = inlined_call_operand.hbm [shape: bf16[2,768], index: 3, kind: input, shape index: {}]   ;;  %s5534_s4 = inlined_call_operand.hbm [shape: bf16[768,256], index: 4, kind: input, shape index: {}]   ;;  %s5535_s5 = inlined_call_operand.vmem [shape: bf16[1,256], index: 5, kind: input, shape index: {}]   ;;  %s5536_s6 = inlined_call_operand.hbm [shape: f32[256,256], index: 6, kind: output, shape index: {}]  }
   0x1   :  { %5587 = sst [smem:[#allocation62_spill]] %s5530_s0 }
   0x2   :  { %5588 = sst [smem:[#allocation63_spill]] %s5531_s1 }
   0x3   :  { %5589 = sst [smem:[#allocation64_spill]] %s5533_s3 }
   0x4   :  { %5590 = sst [smem:[#allocation65_spill]] %s5534_s4 }
   0x5   :  { %5591 = sst [smem:[#allocation66_spill]] %s5535_s5 }
   0x6   :  { %5592 = sst [smem:[#allocation67_spill]] %s5536_s6 }
   0x7   :  { %11 = vsyncpa [#allocation4], 0 }
   0x8   :  { %13 = vsyncpa [#allocation4 + $0x1], 0 }
   0x9   :  { %14 = vsyncpa [#allocation7], 0 }
   0xa   :  { %16 = vsyncpa [#allocation7 + $0x1], 0 }
   0xb   :  { %17 = vsyncpa [#allocation10], 0 }
   0xc   :  { %19 = vsyncpa [#allocation10 + $0x1], 0 }
   0xd   :  { %20 = vsyncpa [#allocation5], 0 }
   0xe   :  { %22 = vsyncpa [#allocation5 + $0x1], 0  ;;  %s4276_s21 = smov 0   ;;  %s4278_s22 = smov 0  }
   0xf   :  { %s4280_s23 = smov 0   ;;  %s4282_s24 = smov 0  }
  0x10   :  { %s4284_s25 = smov 0   ;;  %s4286_s26 = smov 0  }
  0x11   :  { %s4288_s27 = smov 0   ;;  %s4290_s28 = smov 0  }
  0x12   :  { %s4292_s29 = smov 0   ;;  %s4294_s30 = smov 0  }
  0x13   :  { %s4296_s7 = smov 0  }
  0x14 LB: > { %5593 = sst [smem:[#allocation17_spill]] %s4192_s23  ;;  %p55_p0 = scmp.eq.s32.totalorder %s4224_s7, 0  ;;  %s4224_s7 = sphi %s4296_s7, %s28_s7   ;;  %s4220_s30 = sphi %s4294_s30, %s5715_s30   ;;  %s4216_s29 = sphi %s4292_s29, %s5721_s29   ;;  %s4212_s28 = sphi %s4290_s28, %s5713_s28   ;;  %s4208_s27 = sphi %s4288_s27, %s5720_s27   ;;  %s4204_s26 = sphi %s4286_s26, %s5712_s26   ;;  %s4200_s25 = sphi %s4284_s25, %s5719_s25   ;;  %s4196_s24 = sphi %s4282_s24, %s5718_s24   ;;  %s4192_s23 = sphi %s4280_s23, %s5710_s23   ;;  %s4188_s22 = sphi %s4278_s22, %s5717_s22   ;;  %s4184_s21 = sphi %s4276_s21, %s5716_s21  }
  0x15   : > { %5594 = sst [smem:[#allocation18_spill]] %s4204_s26  ;;  %p80_p1 = scmp.ne.s32.totalorder %s4192_s23, %s4188_s22 }
  0x16   : > { %5595 = sst [smem:[#allocation19_spill]] %s4208_s27  ;;  %p5543_p2 = scmp.lt.s32.totalorder %s4224_s7, 4 }
  0x17   : > { %5596 = sst [smem:[#allocation20_spill]] %s4212_s28  ;;  %s5539_s9 = sand.u32 1, %s4224_s7  }
  0x18   : > { %5597 = sst [smem:[#allocation21_spill]] %s4220_s30  ;;  %p82_p3 = por %p80_p1, %p55_p0 }
  0x19   : > { %s5537_s10 = sand.u32 1, %s4192_s23   ;;  %s5538_s11 = smul.u32 192, %s4216_s29 }
  0x1a   : > { %s4343_s12 = smul.u32 384, %s5537_s10  ;;  %p4347_p4 = pnand %p5543_p2, %p82_p3 }
  0x1b   : > { %s5599_s1 = sld [smem:[#allocation63_spill]]  ;;  %s4359_s19 = scalar_lea.sflag [#allocation7], %s5539_s9 }
  0x1c   : > { %s264_s17 = scalar_lea.vmem [#allocation6], %s4343_s12  ;;  %p5542_p5 = pneg %p4347_p4 }
  0x1d   : > { %s271_s18 = sshll.u32 %s264_s17, 4  ;;  %s4226_s8 = smov [#allocation6]   ;;  %s272_s18 = int_to_ptr.vmem [resolvable:$true] %s271_s18 }
  0x1e   : > { %s3969_s20 = scalar_lea.vmem %s272_s18, 6144  ;;  %s3974_s10 = sshll.u32 %s4226_s8, 4  ;;  %s3975_s10 = int_to_ptr.vmem [resolvable:$false] %s3974_s10 }
  0x1f   : > { %p3970_p6 = scmp.ne.s32.totalorder %s272_s18, %s3969_s20  ;;  %s3976_s14 = scalar_lea.vmem %s3975_s10, 12288 }
  0x20   : > { %p3977_p9 = scmp.lt.s32.totalorder %s272_s18, %s3975_s10  ;;  %p3978_p10 = scmp.lt.s32.totalorder %s3976_s14, %s3969_s20 }
  0x21   : > { %s270_s16 = scalar_lea.hbm %s5599_s1, %s5538_s11  ;;  %p3972_p7 = pnand %p3970_p6, %p5542_p5 }
  0x22   : > { %p3979_p11 = por %p3978_p10, %p3977_p9 }
  0x23   : > { %p3973_p8 = pneg %p3972_p7 }
  0x25   : > { %p3980_p12 = pnand %p3979_p11, %p3973_p8 }
  0x27   : > { %3983 = shalt.err (!%p3980_p12)
}
  0x28   : > { %s5541_s15 = smov 384   ;;  %s5544_s17 = smov 192  }
  0x29   : > { %s5545_s11 = smov 12   ;;  %p3029_p13 = scmp.ge.s32.totalorder %s4224_s7, 1 }
  0x2a   : > { %3426 = dma.hbm_to_vmem [thread:$0]  (!%p4347_p4), %s270_s16, 6144, %s272_s18, %s4359_s19, %s5541_s15, %s5544_s17, %s5545_s11  }
  0x2b   : > { %p341_p1 = scmp.lt.s32.totalorder %s4224_s7, 5  ;;  %s5600_s8 = sand.u32 1, %s4192_s23  }
  0x2c   : > { %s3404_s10 = smul.u32 3, %s5600_s8  ;;  %s5602_s3 = sld [smem:[#allocation64_spill]] }
  0x2d   : > { %p4376_p3 = pnand %p3029_p13, %p341_p1  ;;  %s3252_s14 = smul.u32 48, %s4216_s29 }
  0x2e   : > { %s306_s28 = scalar_lea.vmem [#allocation9], %s3404_s10  ;;  %s5603_s27 = sand.u32 1, %s4224_s7  }
  0x2f   : > { %s314_s5 = sshll.u32 %s306_s28, 4  ;;  %s4386_s4 = scalar_lea.sflag [#allocation10], %s5603_s27  ;;  %s315_s5 = int_to_ptr.vmem [resolvable:$true] %s314_s5 }
  0x30   : > { %s3997_s16 = scalar_lea.vmem %s315_s5, 48  ;;  %s4230_s18 = smov [#allocation9]  }
  0x31   : > { %p3998_p6 = scmp.ne.s32.totalorder %s315_s5, %s3997_s16  ;;  %s4002_s8 = sshll.u32 %s4230_s18, 4  ;;  %s4003_s8 = int_to_ptr.vmem [resolvable:$false] %s4002_s8 }
  0x32   : > { %s312_s6 = scalar_lea.hbm %s5602_s3, %s3252_s14  ;;  %s4004_s15 = scalar_lea.vmem %s4003_s8, 96 }
  0x33   : > { %p4000_p7 = pnand %p3998_p6, %p5542_p5  ;;  %p4005_p9 = scmp.lt.s32.totalorder %s315_s5, %s4003_s8 }
  0x34   : > { %p4006_p10 = scmp.lt.s32.totalorder %s4004_s15, %s3997_s16 }
  0x35   : > { %p4001_p8 = pneg %p4000_p7 }
  0x36   : > { %p4007_p11 = por %p4006_p10, %p4005_p9 }
  0x38   : > { %p4008_p12 = pnand %p4007_p11, %p4001_p8 }
  0x3a   : > { %4011 = shalt.err (!%p4008_p12)
}
  0x3b   : > { %3432 = dma.hbm_to_vmem [thread:$0]  (!%p4347_p4), %s312_s6, 48, %s315_s5, %s4386_s4  }
  0x3c   : > { %s4395_s1 = sadd.s32 4294967295, %s4224_s7   ;;  %s3017_s27 = sadd.s32 4294967294, %s4224_s7  }
  0x3d   : > { %s37_s28 = sadd.s32 1, %s4216_s29  ;;  %s40_s9 = sadd.s32 1, %s4220_s30 }
  0x3e   : > { %p38_p13 = scmp.ge.s32.totalorder %s37_s28, 2  ;;  %s47_s15 = sadd.s32 1, %s4204_s26 }
  0x3f   : > { %p54_p1 = scmp.ne.s32.totalorder %s4204_s26, %s4200_s25  ;;  %p60_p6 = scmp.ne.s32.totalorder %s4200_s25, %s4196_s24 }
  0x40   : > { %s5723_s28 = smov (%p38_p13, %s37_s28), 0  ;;  %s5725_s9 = smov (!%p38_p13, %s40_s9), %s4220_s30 }
  0x41   : > { %5604 = sst [smem:[#allocation22_spill]] %s5723_s28  ;;  %p4413_p7 = por %p55_p0, %p54_p1 }
  0x42   : > { %p61_p8 = scmp.eq.s32.totalorder %s4395_s1, 0  ;;  %p42_p9 = scmp.ge.s32.totalorder %s5725_s9, 2 }
  0x43   : > { %s70_s6 = ssub.s32 %s4216_s29, %s5723_s28  ;;  %s5608_s14 = sadd.s32 1, %s4192_s23 }
  0x44   : > { %p4423_p10 = por %p61_p8, %p60_p6  ;;  %p71_p11 = scmp.eq.s32.totalorder %s70_s6, 0 }
  0x45   : > { %s5727_s9 = smov (%p42_p9, %s5725_s9), 0  ;;  %p86_p0 = scmp.ne.s32.totalorder %s4188_s22, %s4184_s21 }
  0x46   : > { %5607 = sst [smem:[#allocation23_spill]] %s5727_s9  ;;  %s44_s18 = ssub.s32 %s4220_s30, %s5727_s9 }
  0x47   : > { %s4432_s16 = scalar_select %p71_p11, %s4192_s23, %s5608_s14  }
  0x48   : > { %p45_p12 = scmp.eq.s32.totalorder %s44_s18, 0  ;;  %p209_p13 = scmp.eq.s32.totalorder %s4395_s1, 3 }
  0x49   : > { %5609 = sst [smem:[#allocation24_spill]] %s4432_s16  ;;  %p4439_p5 = por %p86_p0, %p61_p8 }
  0x4a   : > { %p215_p2 = scmp.eq.s32.totalorder %s3017_s27, 3  ;;  %p4449_p9 = por %p209_p13, %p54_p1 }
  0x4b   : > { %s4444_s17 = scalar_select %p45_p12, %s4204_s26, %s47_s15  }
  0x4c   : > { %s5612_s6 = scalar_select %p4449_p9, 1, 0 }
  0x4d   : > { %5611 = sst [smem:[#allocation25_spill]] %s4444_s17  ;;  %p4456_p11 = por %p215_p2, %p60_p6 }
  0x4e   : > { %s238_s21 = sand.u32 1, %s4204_s26   ;;  %s3249_s18 = sshll.u32 %s4220_s30, 11 }
  0x4f   : > { %s5613_s14 = scalar_select %p4456_p11, 1, 0 }
  0x50   : > { %s3020_s11 = sshll.u32 %s238_s21, 7  ;;  %s5615_s0 = sld [smem:[#allocation62_spill]] }
  0x51   : > { %5614 = sst [smem:[#allocation26_spill]] %s5613_s14  ;;  %s242_s27 = scalar_lea.vmem [#allocation3], %s3020_s11 }
  0x52   : > { %s250_s15 = sshll.u32 %s242_s27, 4  ;;  %p5616_p8 = scmp.lt.s32.totalorder %s4224_s7, 4  ;;  %s251_s15 = int_to_ptr.vmem [resolvable:$true] %s250_s15 }
  0x53   : > { %s239_s16 = scalar_lea.sflag [#allocation4], %s238_s21  ;;  %s4025_s26 = scalar_lea.vmem %s251_s15, 2048 }
  0x54   : > { %p4469_p1 = pnand %p5616_p8, %p4413_p7  ;;  %p4026_p6 = scmp.ne.s32.totalorder %s251_s15, %s4025_s26 }
  0x55   : > { %s4231_s30 = smov [#allocation3]  }
  0x56   : > { %s249_s28 = scalar_lea.hbm %s5615_s0, %s3249_s18  ;;  %p4014_p2 = pneg %p4469_p1 }
  0x57   : > { %s4030_s3 = sshll.u32 %s4231_s30, 4  ;;  %s4031_s3 = int_to_ptr.vmem [resolvable:$false] %s4030_s3 }
  0x58   : > { %p4028_p0 = pnand %p4026_p6, %p4014_p2  ;;  %s4032_s11 = scalar_lea.vmem %s4031_s3, 4096 }
  0x59   : > { %p4033_p13 = scmp.lt.s32.totalorder %s251_s15, %s4031_s3  ;;  %p4034_p11 = scmp.lt.s32.totalorder %s4032_s11, %s4025_s26 }
  0x5a   : > { %p4029_p12 = pneg %p4028_p0 }
  0x5b   : > { %p4035_p9 = por %p4034_p11, %p4033_p13 }
  0x5d   : > { %p4036_p7 = pnand %p4035_p9, %p4029_p12 }
  0x5f   : > { %4039 = shalt.err (!%p4036_p7)
}
  0x60   : > { %s5553_s9 = smov 128   ;;  %s5554_s5 = smov 8  }
  0x61   : > { %3423 = dma.hbm_to_vmem [thread:$0]  (!%p4469_p1), %s249_s28, 2048, %s251_s15, %s239_s16, %s5553_s9, %s5553_s9, %s5554_s5  }
  0x62   : > { %s5618_s30 = smul.u32 192, %s4216_s29  ;;  %s285_s27 = scalar_lea.vmem [#allocation8], %s4343_s12 }
  0x63   : > { %s292_s3 = sshll.u32 %s285_s27, 4  ;;  %s3257_s11 = smul.u32 6144, %s4216_s29  ;;  %s293_s3 = int_to_ptr.vmem [resolvable:$true] %s292_s3 }
  0x64   : > { %s291_s26 = scalar_lea.hbm %s5532_s2, %s5618_s30  ;;  %s4053_s0 = scalar_lea.vmem %s293_s3, 6144 }
  0x65   : > { %p4054_p9 = scmp.ne.s32.totalorder %s293_s3, %s4053_s0  ;;  %p5619_p11 = pneg %p4347_p4 }
  0x66   : > { %s4234_s17 = smov [#allocation8]  }
  0x67   : > { %p4056_p8 = pnand %p4054_p9, %p5619_p11  ;;  %s4058_s23 = sshll.u32 %s4234_s17, 4  ;;  %s4059_s23 = int_to_ptr.vmem [resolvable:$false] %s4058_s23 }
  0x68   : > { %s4060_s14 = scalar_lea.vmem %s4059_s23, 12288  ;;  %p4061_p1 = scmp.lt.s32.totalorder %s293_s3, %s4059_s23 }
  0x69   : > { %p4057_p2 = pneg %p4056_p8  ;;  %p4062_p6 = scmp.lt.s32.totalorder %s4060_s14, %s4053_s0 }
  0x6b   : > { %p4063_p0 = por %p4062_p6, %p4061_p1 }
  0x6d   : > { %p4064_p12 = pnand %p4063_p0, %p4057_p2 }
  0x6f   : > { %4067 = shalt.err (!%p4064_p12)
}
  0x70   : > { %s5620_s28 = smov 12   ;;  %s5621_s16 = smov 192  }
  0x71   : > { %s5622_s15 = smov 384   ;;  %s5623_s18 = sld [smem:[#allocation65_spill]] }
  0x72   : > { %3429 = dma.hbm_to_vmem [thread:$0]  (!%p4347_p4), %s291_s26, 6144, %s293_s3, %s4359_s19, %s5622_s15, %s5621_s16, %s5620_s28  }
  0x73   : > { %s325_s17 = scalar_lea.vmem [#allocation11], %s4343_s12  ;;  %p5624_p7 = pmov %p5619_p11 }
  0x74   : > { %s333_s9 = sshll.u32 %s325_s17, 4  ;;  %s4235_s23 = smov [#allocation11]   ;;  %s334_s9 = int_to_ptr.vmem [resolvable:$true] %s333_s9 }
  0x75   : > { %s4081_s0 = scalar_lea.vmem %s334_s9, 6144  ;;  %s4086_s14 = sshll.u32 %s4235_s23, 4  ;;  %s4087_s14 = int_to_ptr.vmem [resolvable:$false] %s4086_s14 }
  0x76   : > { %p4082_p13 = scmp.ne.s32.totalorder %s334_s9, %s4081_s0  ;;  %s4088_s5 = scalar_lea.vmem %s4087_s14, 12288 }
  0x77   : > { %s332_s27 = scalar_lea.hbm %s5623_s18, %s3257_s11  ;;  %p4089_p8 = scmp.lt.s32.totalorder %s334_s9, %s4087_s14 }
  0x78   : > { %p4084_p9 = pnand %p4082_p13, %p5624_p7  ;;  %p4090_p2 = scmp.lt.s32.totalorder %s4088_s5, %s4081_s0 }
  0x7a   : > { %p4085_p11 = pneg %p4084_p9  ;;  %p4091_p1 = por %p4090_p2, %p4089_p8 }
  0x7c   : > { %p4092_p6 = pnand %p4091_p1, %p4085_p11 }
  0x7e   : > { %4095 = shalt.err (!%p4092_p6)
}
  0x7f   : > { %s5625_s12 = smov 8   ;;  %s5626_s19 = smov 128  }
  0x80   : > { %3435 = dma.hbm_to_vmem [thread:$0]  (!%p4347_p4), %s332_s27, 6144, %s334_s9, %s4386_s4, %s5626_s19, %s5626_s19, %s5625_s12  }
  0x81   : > { %345 = sbr.rel (%p4376_p3) target bundleno = 829 (0x33d), region = 44 }
  0x86   : > { %s4512_s26 = sand.u32 1, %s4200_s25  }
  0x87   : > { %s3030_s5 = sshll.u32 %s4512_s26, 7  ;;  %s348_s3 = scalar_lea.sflag [#allocation4], %s4512_s26 }
  0x88   : > { %s4516_s11 = scalar_lea.vmem [#allocation3], %s3030_s5 }
  0x89   : > { %4167 = dma.done.wait (%p4423_p10), %s348_s3, 2048  }
  0x8a   : > { %4169 = vsyncadd (%p4423_p10), %s348_s3, 4294965248  ;;  %s356_s4 = sand.u32 1, %s4395_s1   ;;  %s358_s13 = sand.u32 1, %s4188_s22  }
  0x8b   : > { %s3406_s20 = smul.u32 384, %s358_s13  ;;  %s357_s9 = scalar_lea.sflag [#allocation7], %s356_s4 }
  0x8d   : > { %s4524_s28 = scalar_lea.vmem [#allocation6], %s3406_s20 }
  0x8e   : > { %4171 = dma.done.wait (%p4439_p5), %s357_s9, 12288  }
  0x8f   : > { %4173 = vsyncadd (%p4439_p5), %s357_s9, 4294955008  ;;  %s4530_s16 = smul.u32 3, %s358_s13  ;;  %s4532_s10 = scalar_lea.vmem [#allocation8], %s3406_s20 }
  0x90   : > { %s375_s15 = scalar_lea.sflag [#allocation10], %s356_s4 }
  0x91   : > { %s378_s30 = scalar_lea.vmem [#allocation9], %s4530_s16 }
  0x92   : > { %4175 = dma.done.wait (%p4439_p5), %s375_s15, 6192  }
  0x93   : > { %4177 = vsyncadd (%p4439_p5), %s375_s15, 4294961104  ;;  %s3031_s1 = sshll.u32 %s4512_s26, 8  ;;  %s4540_s21 = scalar_lea.vmem [#allocation11], %s3406_s20 }
  0x94   : > { %s4542_s18 = scalar_lea.vmem [#allocation12], %s3031_s1  ;;  %s5627_s27 = sld [smem:[#allocation19_spill]] }
  0x9a   : > { %p3032_p4 = scmp.ne.s32.totalorder %s5627_s27, 0 }
  0x9c   : > { %446 = sbr.rel (%p3032_p4) target bundleno = 178 (0xb2), region = 68 }
  0xa1   : > { %v4236_v0 = vmov 0.0  }
  0xa2   : > { %447 = vst [vmem:[#allocation2 + $0xb0] sm:$0xff] %v4236_v0  ;;  %448 = vst [vmem:[#allocation2] sm:$0xff] %v4236_v0 }
  0xa3   : > { %449 = vst [vmem:[#allocation2 + $0xd8] sm:$0xff] %v4236_v0  ;;  %450 = vst [vmem:[#allocation2 + $0x18] sm:$0xff] %v4236_v0 }
  0xa4   : > { %451 = vst [vmem:[#allocation2 + $0x50] sm:$0xff] %v4236_v0  ;;  %452 = vst [vmem:[#allocation2 + $0x68] sm:$0xff] %v4236_v0 }
  0xa5   : > { %453 = vst [vmem:[#allocation2 + $0x30] sm:$0xff] %v4236_v0  ;;  %454 = vst [vmem:[#allocation2 + $0x48] sm:$0xff] %v4236_v0 }
  0xa6   : > { %455 = vst [vmem:[#allocation2 + $0x80] sm:$0xff] %v4236_v0  ;;  %456 = vst [vmem:[#allocation2 + $0x88] sm:$0xff] %v4236_v0 }
  0xa7   : > { %457 = vst [vmem:[#allocation2 + $0xe8] sm:$0xff] %v4236_v0  ;;  %458 = vst [vmem:[#allocation2 + $0xb8] sm:$0xff] %v4236_v0 }
  0xa8   : > { %459 = vst [vmem:[#allocation2 + $0x60] sm:$0xff] %v4236_v0  ;;  %460 = vst [vmem:[#allocation2 + $0xf0] sm:$0xff] %v4236_v0 }
  0xa9   : > { %461 = vst [vmem:[#allocation2 + $0x8] sm:$0xff] %v4236_v0  ;;  %462 = vst [vmem:[#allocation2 + $0x78] sm:$0xff] %v4236_v0 }
  0xaa   : > { %463 = vst [vmem:[#allocation2 + $0x38] sm:$0xff] %v4236_v0  ;;  %464 = vst [vmem:[#allocation2 + $0x58] sm:$0xff] %v4236_v0 }
  0xab   : > { %465 = vst [vmem:[#allocation2 + $0x40] sm:$0xff] %v4236_v0  ;;  %466 = vst [vmem:[#allocation2 + $0xc8] sm:$0xff] %v4236_v0 }
  0xac   : > { %467 = vst [vmem:[#allocation2 + $0xe0] sm:$0xff] %v4236_v0  ;;  %468 = vst [vmem:[#allocation2 + $0x90] sm:$0xff] %v4236_v0 }
  0xad   : > { %469 = vst [vmem:[#allocation2 + $0x70] sm:$0xff] %v4236_v0  ;;  %470 = vst [vmem:[#allocation2 + $0xc0] sm:$0xff] %v4236_v0 }
  0xae   : > { %471 = vst [vmem:[#allocation2 + $0xa8] sm:$0xff] %v4236_v0  ;;  %472 = vst [vmem:[#allocation2 + $0xd0] sm:$0xff] %v4236_v0 }
  0xaf   : > { %473 = vst [vmem:[#allocation2 + $0x10] sm:$0xff] %v4236_v0  ;;  %474 = vst [vmem:[#allocation2 + $0x28] sm:$0xff] %v4236_v0 }
  0xb0   : > { %475 = vst [vmem:[#allocation2 + $0xa0] sm:$0xff] %v4236_v0  ;;  %476 = vst [vmem:[#allocation2 + $0xf8] sm:$0xff] %v4236_v0 }
  0xb1   : > { %477 = vst [vmem:[#allocation2 + $0x20] sm:$0xff] %v4236_v0  ;;  %478 = vst [vmem:[#allocation2 + $0x98] sm:$0xff] %v4236_v0 }
  0xb2 PF: > { %v3539_v1 = vld [vmem:[%s4524_s28 + $0xac] ss:$12 sps:$4 sm:$0xff]   ;;  %v3541_v2 = vld [vmem:[%s4524_s28 + $0x170] ss:$12 sps:$4 sm:$0xff]   ;;  %v3542_v3 = vld [vmem:[%s4524_s28 + $0xa8] ss:$12 sps:$4 sm:$0xff]  }
  0xb3   : > { %925 = vmatprep.subr.bf16.mxu0 %v3539_v1  ;;  %3258 = vmatprep.subr.bf16.mxu1 %v3541_v2  ;;  %v3543_v4 = vld [vmem:[%s4524_s28 + $0xb0] ss:$12 sps:$4 sm:$0xff]   ;;  %v3544_v5 = vld [vmem:[%s4524_s28 + $0x94] ss:$12 sps:$4 sm:$0xff]   ;;  %v3546_v6 = vld [vmem:[%s4524_s28 + $0x158] ss:$12 sps:$4 sm:$0xff]  }
  0xb4   : > { %926 = vmatpush1.bf16.msra.mxu0 %v3542_v3  ;;  %3259 = vmatpush3.bf16.msra.mxu1 %v3543_v4  ;;  %v3547_v7 = vld [vmem:[%s4524_s28 + $0x90] ss:$12 sps:$4 sm:$0xff]   ;;  %v3548_v8 = vld [vmem:[%s4524_s28 + $0x98] ss:$12 sps:$4 sm:$0xff]   ;;  %v3551_v10 = vld [vmem:[%s4524_s28 + $0x140] ss:$12 sps:$4 sm:$0xff]  }
  0xb5   : > { %927 = vmatprep.subr.bf16.mxu0 %v3544_v5  ;;  %3260 = vmatprep.subr.bf16.mxu1 %v3546_v6  ;;  %v3549_v9 = vld [vmem:[%s4524_s28 + $0x7c] ss:$12 sps:$4 sm:$0xff]   ;;  %v3552_v11 = vld [vmem:[%s4524_s28 + $0x78] ss:$12 sps:$4 sm:$0xff]   ;;  %v3553_v12 = vld [vmem:[%s4524_s28 + $0x80] ss:$12 sps:$4 sm:$0xff]  }
  0xb6   : > { %v3554_v13 = vld [vmem:[%s4524_s28 + $0x64] ss:$12 sps:$4 sm:$0xff]   ;;  %v3556_v14 = vld [vmem:[%s4524_s28 + $0x128] ss:$12 sps:$4 sm:$0xff]   ;;  %v3557_v15 = vld [vmem:[%s4524_s28 + $0x60] ss:$12 sps:$4 sm:$0xff]  }
  0xb7   : > { %v3558_v16 = vld [vmem:[%s4524_s28 + $0x68] ss:$12 sps:$4 sm:$0xff]   ;;  %v3559_v17 = vld [vmem:[%s4524_s28 + $0x4c] ss:$12 sps:$4 sm:$0xff]   ;;  %v3561_v18 = vld [vmem:[%s4524_s28 + $0x110] ss:$12 sps:$4 sm:$0xff]  }
  0xb8   : > { %928 = vmatpush1.bf16.msra.mxu0 %v3547_v7  ;;  %3261 = vmatpush3.bf16.msra.mxu1 %v3548_v8  ;;  %v3562_v19 = vld [vmem:[%s4524_s28 + $0x48] ss:$12 sps:$4 sm:$0xff]   ;;  %v3563_v20 = vld [vmem:[%s4524_s28 + $0x50] ss:$12 sps:$4 sm:$0xff]   ;;  %v3566_v22 = vld [vmem:[%s4524_s28 + $0xf8] ss:$12 sps:$4 sm:$0xff]  }
  0xb9   : > { %929 = vmatprep.subr.bf16.mxu0 %v3549_v9  ;;  %3262 = vmatprep.subr.bf16.mxu1 %v3551_v10  ;;  %v3564_v21 = vld [vmem:[%s4524_s28 + $0x34] ss:$12 sps:$4 sm:$0xff]   ;;  %v3567_v23 = vld [vmem:[%s4524_s28 + $0x30] ss:$12 sps:$4 sm:$0xff]   ;;  %v3568_v24 = vld [vmem:[%s4524_s28 + $0x38] ss:$12 sps:$4 sm:$0xff]  }
  0xba   : > { %v3569_v25 = vld [vmem:[%s4524_s28 + $0x1c] ss:$12 sps:$4 sm:$0xff]   ;;  %v3571_v26 = vld [vmem:[%s4524_s28 + $0xe0] ss:$12 sps:$4 sm:$0xff]   ;;  %v3572_v27 = vld [vmem:[%s4524_s28 + $0x18] ss:$12 sps:$4 sm:$0xff]  }
  0xbb   : > { %v3573_v28 = vld [vmem:[%s4524_s28 + $0x20] ss:$12 sps:$4 sm:$0xff]   ;;  %v3574_v29 = vld [vmem:[%s4524_s28 + $0x4] ss:$12 sps:$4 sm:$0xff]   ;;  %v3576_v30 = vld [vmem:[%s4524_s28 + $0xc8] ss:$12 sps:$4 sm:$0xff]  }
  0xbc   : > { %930 = vmatpush1.bf16.msra.mxu0 %v3552_v11  ;;  %3263 = vmatpush3.bf16.msra.mxu1 %v3553_v12  ;;  %v4576_v31 = vld [vmem:[%s4516_s11 + $0x4] ss:$8 sps:$4 sm:$0xff]   ;;  %v3578_v33 = vld [vmem:[%s4524_s28 + $0x8] ss:$12 sps:$4 sm:$0xff]   ;;  %v3590_v42 = vld [vmem:[%s4524_s28 + $0x150] ss:$12 sps:$4 sm:$0xff]  }
  0xbd   : > { %931 = vmatprep.subr.bf16.mxu0 %v3554_v13  ;;  %3264 = vmatprep.subr.bf16.mxu1 %v3556_v14  ;;  %v3577_v32 = vld [vmem:[%s4524_s28] ss:$12 sps:$4 sm:$0xff]   ;;  %v3584_v37 = vld [vmem:[%s4524_s28 + $0x168] ss:$12 sps:$4 sm:$0xff]   ;;  %v3591_v43 = vld [vmem:[%s4532_s10 + $0x90] ss:$12 sps:$4 sm:$0xff]  }
  0xbe   : > { %v3581_v34 = vld [vmem:[%s4524_s28 + $0x16c] ss:$12 sps:$4 sm:$0xff]   ;;  %1070 = vmatprep.mubr.bf16.mxu1 %v4576_v31  ;;  %v4583_v35 = vld [vmem:[%s4516_s11] ss:$8 sps:$4 sm:$0xff]   ;;  %957 = vmatprep.mubr.bf16.mxu0 %v4576_v31  ;;  %v4592_v41 = vld [vmem:[%s4516_s11 + $0x14] ss:$8 sps:$4 sm:$0xff]  }
  0xbf   : > { %v3587_v36 = vld [vmem:[%s4532_s10 + $0xac] ss:$12 sps:$4 sm:$0xff]   ;;  %v3585_v38 = vld [vmem:[%s4532_s10 + $0xa8] ss:$12 sps:$4 sm:$0xff]   ;;  %v3603_v49 = vld [vmem:[%s4524_s28 + $0x124] ss:$12 sps:$4 sm:$0xff]  }
  0xc0   : > { %932 = vmatpush1.bf16.msra.mxu0 %v3557_v15  ;;  %3265 = vmatpush3.bf16.msra.mxu1 %v3558_v16  ;;  %v3588_v39 = vld [vmem:[%s4524_s28 + $0x154] ss:$12 sps:$4 sm:$0xff]   ;;  %v3596_v44 = vld [vmem:[%s4524_s28 + $0x13c] ss:$12 sps:$4 sm:$0xff]   ;;  %v4601_v46 = vld [vmem:[%s4516_s11 + $0x10] ss:$8 sps:$4 sm:$0xff]  }
  0xc1   : > { %933 = vmatprep.subr.bf16.mxu0 %v3559_v17  ;;  %3266 = vmatprep.subr.bf16.mxu1 %v3561_v18  ;;  %v3593_v40 = vld [vmem:[%s4532_s10 + $0x94] ss:$12 sps:$4 sm:$0xff]   ;;  %v3602_v45 = vld [vmem:[%s4532_s10 + $0x7c] ss:$12 sps:$4 sm:$0xff]   ;;  %v3599_v47 = vld [vmem:[%s4524_s28 + $0x138] ss:$12 sps:$4 sm:$0xff]  }
  0xc2   : > { %v3600_v48 = vld [vmem:[%s4532_s10 + $0x78] ss:$12 sps:$4 sm:$0xff]   ;;  %v3605_v52 = vld [vmem:[%s4524_s28 + $0x120] ss:$12 sps:$4 sm:$0xff]   ;;  %v3614_v57 = vld [vmem:[%s4524_s28 + $0x108] ss:$12 sps:$4 sm:$0xff]  }
  0xc3   : > { %v3608_v50 = vld [vmem:[%s4532_s10 + $0x64] ss:$12 sps:$4 sm:$0xff]   ;;  %v3606_v53 = vld [vmem:[%s4532_s10 + $0x60] ss:$12 sps:$4 sm:$0xff]   ;;  %v3615_v58 = vld [vmem:[%s4532_s10 + $0x48] ss:$12 sps:$4 sm:$0xff]  }
  0xc4   : > { %934 = vmatpush1.bf16.msra.mxu0 %v3562_v19  ;;  %3267 = vmatpush3.bf16.msra.mxu1 %v3563_v20  ;;  %v4608_v51 = vld [vmem:[%s4516_s11 + $0x24] ss:$8 sps:$4 sm:$0xff]   ;;  %v4617_v56 = vld [vmem:[%s4516_s11 + $0x20] ss:$8 sps:$4 sm:$0xff]   ;;  %v4624_v61 = vld [vmem:[%s4516_s11 + $0x34] ss:$8 sps:$4 sm:$0xff]  }
  0xc5   : > { %935 = vmatprep.subr.bf16.mxu0 %v3564_v21  ;;  %3268 = vmatprep.subr.bf16.mxu1 %v3566_v22  ;;  %v3611_v54 = vld [vmem:[%s4524_s28 + $0x10c] ss:$12 sps:$4 sm:$0xff]   ;;  %v3618_v59 = vld [vmem:[%s4524_s28 + $0xf4] ss:$12 sps:$4 sm:$0xff]   ;;  %v3620_v62 = vld [vmem:[%s4524_s28 + $0xf0] ss:$12 sps:$4 sm:$0xff]  }
  0xc6   : > { %v3617_v55 = vld [vmem:[%s4532_s10 + $0x4c] ss:$12 sps:$4 sm:$0xff]   ;;  %v3623_v60 = vld [vmem:[%s4532_s10 + $0x34] ss:$12 sps:$4 sm:$0xff]   ;;  %v3621_v63 = vld [vmem:[%s4532_s10 + $0x30] ss:$12 sps:$4 sm:$0xff]  }
  0xc7   : > { %v3626_v0 = vld [vmem:[%s4524_s28 + $0xdc] ss:$12 sps:$4 sm:$0xff]   ;;  %v4632_v1 = vld [vmem:[%s4516_s11 + $0x30] ss:$8 sps:$4 sm:$0xff]   ;;  %v4640_v7 = vld [vmem:[%s4516_s11 + $0x44] ss:$8 sps:$4 sm:$0xff]  }
  0xc8   : > { %936 = vmatpush1.bf16.msra.mxu0 %v3567_v23  ;;  %3269 = vmatpush3.bf16.msra.mxu1 %v3568_v24  ;;  %v3632_v2 = vld [vmem:[%s4532_s10 + $0x1c] ss:$12 sps:$4 sm:$0xff]   ;;  %v3629_v3 = vld [vmem:[%s4524_s28 + $0xd8] ss:$12 sps:$4 sm:$0xff]   ;;  %v3635_v8 = vld [vmem:[%s4524_s28 + $0xc0] ss:$12 sps:$4 sm:$0xff]  }
  0xc9   : > { %937 = vmatprep.subr.bf16.mxu0 %v3569_v25  ;;  %3270 = vmatprep.subr.bf16.mxu1 %v3571_v26  ;;  %v3630_v4 = vld [vmem:[%s4532_s10 + $0x18] ss:$12 sps:$4 sm:$0xff]   ;;  %v3636_v9 = vld [vmem:[%s4532_s10] ss:$12 sps:$4 sm:$0xff]   ;;  %v3642_v10 = vld [vmem:[%s4532_s10 + $0x170] ss:$12 sps:$4 sm:$0xff]  }
  0xca   : > { %v3633_v5 = vld [vmem:[%s4524_s28 + $0xc4] ss:$12 sps:$4 sm:$0xff]   ;;  %v3646_v11 = vld [vmem:[%s4532_s10 + $0x16c] ss:$12 sps:$4 sm:$0xff]   ;;  %v4649_v12 = vld [vmem:[%s4516_s11 + $0x40] ss:$8 sps:$4 sm:$0xff]  }
  0xcb   : > { %v3638_v6 = vld [vmem:[%s4532_s10 + $0x4] ss:$12 sps:$4 sm:$0xff]   ;;  %v3644_v14 = vld [vmem:[%s4532_s10 + $0x168] ss:$12 sps:$4 sm:$0xff]   ;;  %v3664_v20 = vld [vmem:[%s4532_s10 + $0x140] ss:$12 sps:$4 sm:$0xff]  }
  0xcc   : > { %938 = vmatpush1.bf16.msra.mxu0 %v3572_v27  ;;  %3271 = vmatpush3.bf16.msra.mxu1 %v3573_v28  ;;  %v3643_v13 = vld [vmem:[%s4532_s10 + $0xb0] ss:$12 sps:$4 sm:$0xff]   ;;  %v3649_v15 = vld [vmem:[%s4532_s10 + $0x154] ss:$12 sps:$4 sm:$0xff]   ;;  %v3653_v17 = vld [vmem:[%s4532_s10 + $0x158] ss:$12 sps:$4 sm:$0xff]  }
  0xcd   : > { %939 = vmatprep.subr.bf16.mxu0 %v3574_v29  ;;  %3272 = vmatprep.subr.bf16.mxu1 %v3576_v30  ;;  %v4655_v16 = vld [vmem:[%s4516_s11 + $0x54] ss:$8 sps:$4 sm:$0xff]   ;;  %v3654_v18 = vld [vmem:[%s4532_s10 + $0x98] ss:$12 sps:$4 sm:$0xff]   ;;  %v3665_v26 = vld [vmem:[%s4532_s10 + $0x80] ss:$12 sps:$4 sm:$0xff]  }
  0xce   : > { %v3647_v19 = vld [vmem:[%s4532_s10 + $0x150] ss:$12 sps:$4 sm:$0xff]   ;;  %v3655_v23 = vld [vmem:[%s4532_s10 + $0x138] ss:$12 sps:$4 sm:$0xff]   ;;  %v3675_v27 = vld [vmem:[%s4532_s10 + $0x128] ss:$12 sps:$4 sm:$0xff]  }
  0xcf   : > { %v3657_v21 = vld [vmem:[%s4532_s10 + $0x13c] ss:$12 sps:$4 sm:$0xff]   ;;  %v4667_v22 = vld [vmem:[%s4516_s11 + $0x50] ss:$8 sps:$4 sm:$0xff]   ;;  %v4672_v25 = vld [vmem:[%s4516_s11 + $0x64] ss:$8 sps:$4 sm:$0xff]  }
  0xd0   : > { %940 = vmatpush1.bf16.msra.mxu0 %v3577_v32  ;;  %3273 = vmatpush3.bf16.msra.mxu1 %v3578_v33  ;;  %v3660_v24 = vld [vmem:[%s4532_s10 + $0x124] ss:$12 sps:$4 sm:$0xff]   ;;  %v3658_v28 = vld [vmem:[%s4532_s10 + $0x120] ss:$12 sps:$4 sm:$0xff]   ;;  %v3676_v32 = vld [vmem:[%s4532_s10 + $0x68] ss:$12 sps:$4 sm:$0xff]  }
  0xd1   : > { %941 = vmatprep.subr.bf16.mxu0 %v3581_v34  ;;  %1818 = vmatprep.subr.bf16.mxu1 %v3587_v36  ;;  %v3668_v29 = vld [vmem:[%s4532_s10 + $0x10c] ss:$12 sps:$4 sm:$0xff]   ;;  %v4683_v30 = vld [vmem:[%s4516_s11 + $0x60] ss:$8 sps:$4 sm:$0xff]   ;;  %v3683_v34 = vld [vmem:[%s4532_s10 + $0x110] ss:$12 sps:$4 sm:$0xff]  }
  0xd2   : > { %v3666_v33 = vld [vmem:[%s4532_s10 + $0x108] ss:$12 sps:$4 sm:$0xff]   ;;  %s5699_s8 = sld [smem:[#allocation19_spill]] }
  0xd3   : > { %1071 = vmatmul.mubr.bf16.vlgmr.msra.gmra.mxu1 %v4583_v35  ;;  %v3671_v36 = vld [vmem:[%s4532_s10 + $0xf4] ss:$12 sps:$4 sm:$0xff]  }
  0xd4   : > { %942 = vmatpush2.bf16.msra.mxu0 %v3584_v37  ;;  %1819 = vmatpush1.bf16.msra.mxu1 %v3585_v38  ;;  %v4690_v37 = vld [vmem:[%s4516_s11 + $0x74] ss:$8 sps:$4 sm:$0xff]  }
  0xd5   : > { %943 = vmatprep.subr.bf16.mxu0 %v3588_v39  ;;  %1820 = vmatprep.subr.bf16.mxu1 %v3593_v40  ;;  %v3684_v38 = vld [vmem:[%s4532_s10 + $0x50] ss:$12 sps:$4 sm:$0xff]   ;;  %v3685_v40 = vld [vmem:[%s4532_s10 + $0xf8] ss:$12 sps:$4 sm:$0xff]  }
  0xd6   : > { %1078 = vmatprep.mubr.bf16.mxu1 %v4592_v41  ;;  %v3669_v39 = vld [vmem:[%s4532_s10 + $0xf0] ss:$12 sps:$4 sm:$0xff]  }
  0xd8   : > { %944 = vmatpush2.bf16.msra.mxu0 %v3590_v42  ;;  %1821 = vmatpush1.bf16.msra.mxu1 %v3591_v43  ;;  %v3679_v42 = vld [vmem:[%s4532_s10 + $0xdc] ss:$12 sps:$4 sm:$0xff]   ;;  %v3686_v43 = vld [vmem:[%s4532_s10 + $0x38] ss:$12 sps:$4 sm:$0xff]   ;;  %p3241_p5 = scmp.ne.s32.totalorder %s5699_s8, 1 }
  0xd9   : > { %945 = vmatprep.subr.bf16.mxu0 %v3596_v44  ;;  %1822 = vmatprep.subr.bf16.mxu1 %v3602_v45  ;;  %v3687_v44 = vld [vmem:[%s4532_s10 + $0xe0] ss:$12 sps:$4 sm:$0xff]   ;;  %v4703_v45 = vld [vmem:[%s4516_s11 + $0x70] ss:$8 sps:$4 sm:$0xff]   ;;  %s5700_s23 = sld [smem:[#allocation66_spill]] (!%p3241_p5) }
  0xdb   : > { %1079 = vmatmul.mubr.bf16.gmra.mxu1 %v4601_v46 }
  0xdc   : > { %946 = vmatpush2.bf16.msra.mxu0 %v3599_v47  ;;  %1823 = vmatpush1.bf16.msra.mxu1 %v3600_v48  ;;  %v3677_v47 = vld [vmem:[%s4532_s10 + $0xd8] ss:$12 sps:$4 sm:$0xff]  }
  0xdd   : > { %947 = vmatprep.subr.bf16.mxu0 %v3603_v49  ;;  %1824 = vmatprep.subr.bf16.mxu1 %v3608_v50  ;;  %v3682_v48 = vld [vmem:[%s4532_s10 + $0xc4] ss:$12 sps:$4 sm:$0xff]   ;;  %v3688_v49 = vld [vmem:[%s4532_s10 + $0x20] ss:$12 sps:$4 sm:$0xff]   ;;  %v3689_v50 = vld [vmem:[%s4532_s10 + $0xc8] ss:$12 sps:$4 sm:$0xff]  }
  0xde   : > { %1086 = vmatprep.mubr.bf16.mxu1 %v4608_v51 }
  0xe0   : > { %948 = vmatpush2.bf16.msra.mxu0 %v3605_v52  ;;  %1825 = vmatpush1.bf16.msra.mxu1 %v3606_v53  ;;  %v3680_v52 = vld [vmem:[%s4532_s10 + $0xc0] ss:$12 sps:$4 sm:$0xff]   ;;  %v3690_v53 = vld [vmem:[%s4532_s10 + $0x8] ss:$12 sps:$4 sm:$0xff]  }
  0xe1   : > { %949 = vmatprep.subr.bf16.mxu0 %v3611_v54  ;;  %1826 = vmatprep.subr.bf16.mxu1 %v3617_v55  ;;  %v3693_v54 = vld [vmem:[%s4540_s21 + $0x74] ss:$8 sps:$4 sm:$0xff]   ;;  %v3691_v55 = vld [vmem:[%s4540_s21 + $0x70] ss:$8 sps:$4 sm:$0xff]  }
  0xe3   : > { %1087 = vmatmul.mubr.bf16.gmra.mxu1 %v4617_v56 }
  0xe4   : > { %950 = vmatpush2.bf16.msra.mxu0 %v3614_v57  ;;  %1827 = vmatpush1.bf16.msra.mxu1 %v3615_v58  ;;  %v3696_v57 = vld [vmem:[%s4540_s21 + $0x64] ss:$8 sps:$4 sm:$0xff]   ;;  %v3694_v58 = vld [vmem:[%s4540_s21 + $0x60] ss:$8 sps:$4 sm:$0xff]  }
  0xe5   : > { %951 = vmatprep.subr.bf16.mxu0 %v3618_v59  ;;  %1828 = vmatprep.subr.bf16.mxu1 %v3623_v60  ;;  %v3699_v59 = vld [vmem:[%s4540_s21 + $0x54] ss:$8 sps:$4 sm:$0xff]   ;;  %v3697_v60 = vld [vmem:[%s4540_s21 + $0x50] ss:$8 sps:$4 sm:$0xff]  }
  0xe6   : > { %1094 = vmatprep.mubr.bf16.mxu1 %v4624_v61 }
  0xe8   : > { %952 = vmatpush2.bf16.msra.mxu0 %v3620_v62  ;;  %1829 = vmatpush1.bf16.msra.mxu1 %v3621_v63  ;;  %v3702_v62 = vld [vmem:[%s4540_s21 + $0x44] ss:$8 sps:$4 sm:$0xff]   ;;  %v3700_v63 = vld [vmem:[%s4540_s21 + $0x40] ss:$8 sps:$4 sm:$0xff]  }
  0xe9   : > { %953 = vmatprep.subr.bf16.mxu0 %v3626_v0  ;;  %1830 = vmatprep.subr.bf16.mxu1 %v3632_v2  ;;  %v3705_v0 = vld [vmem:[%s4540_s21 + $0x34] ss:$8 sps:$4 sm:$0xff]   ;;  %v3708_v2 = vld [vmem:[%s4540_s21 + $0x24] ss:$8 sps:$4 sm:$0xff]  }
  0xeb   : > { %1095 = vmatmul.mubr.bf16.gmra.mxu1 %v4632_v1 }
  0xec   : > { %954 = vmatpush2.bf16.msra.mxu0 %v3629_v3  ;;  %1831 = vmatpush1.bf16.msra.mxu1 %v3630_v4  ;;  %v3706_v3 = vld [vmem:[%s4540_s21 + $0x20] ss:$8 sps:$4 sm:$0xff]   ;;  %v3714_v4 = vld [vmem:[%s4540_s21 + $0x4] ss:$8 sps:$4 sm:$0xff]  }
  0xed   : > { %955 = vmatprep.subr.bf16.mxu0 %v3633_v5  ;;  %1832 = vmatprep.subr.bf16.mxu1 %v3638_v6  ;;  %v3712_v5 = vld [vmem:[%s4540_s21] ss:$8 sps:$4 sm:$0xff]  }
  0xee   : > { %1102 = vmatprep.mubr.bf16.mxu1 %v4640_v7  ;;  %v3718_v6 = vld [vmem:[%s4540_s21 + $0xe0] ss:$8 sps:$4 sm:$0xff]  }
  0xf0   : > { %956 = vmatpush2.bf16.msra.mxu0 %v3635_v8  ;;  %1833 = vmatpush1.bf16.msra.mxu1 %v3636_v9  ;;  %v3721_v8 = vld [vmem:[%s4540_s21 + $0xd0] ss:$8 sps:$4 sm:$0xff]   ;;  %v3724_v9 = vld [vmem:[%s4540_s21 + $0xc0] ss:$8 sps:$4 sm:$0xff]  }
  0xf1   : > { %3322 = vmatprep.subr.bf16.mxu0 %v3642_v10  ;;  %1834 = vmatprep.subr.bf16.mxu1 %v3646_v11  ;;  %v3730_v10 = vld [vmem:[%s4540_s21 + $0xb0] ss:$8 sps:$4 sm:$0xff]   ;;  %v3735_v11 = vld [vmem:[%s4540_s21 + $0xa4] ss:$8 sps:$4 sm:$0xff]  }
  0xf3   : > { %958 = vmatmul.mubr.bf16.vlgmr.msra.gmra.mxu0 %v4583_v35  ;;  %1103 = vmatmul.mubr.bf16.gmra.mxu1 %v4649_v12 }
  0xf4   : > { %3323 = vmatpush3.bf16.msra.mxu0 %v3643_v13  ;;  %1835 = vmatpush2.bf16.msra.mxu1 %v3644_v14  ;;  %v3741_v13 = vld [vmem:[%s4540_s21 + $0x94] ss:$8 sps:$4 sm:$0xff]   ;;  %v3739_v14 = vld [vmem:[%s4540_s21 + $0x90] ss:$8 sps:$4 sm:$0xff]  }
  0xf5   : > { %967 = vmatprep.mubr.bf16.mxu0 %v4592_v41  ;;  %1836 = vmatprep.subr.bf16.mxu1 %v3649_v15  ;;  %v3729_v15 = vld [vmem:[%s4540_s21 + $0x174] ss:$8 sps:$4 sm:$0xff]  }
  0xf6   : > { %1110 = vmatprep.mubr.bf16.mxu1 %v4655_v16  ;;  %3324 = vmatprep.subr.bf16.mxu0 %v3653_v17  ;;  %v3744_v17 = vld [vmem:[%s4540_s21 + $0x84] ss:$8 sps:$4 sm:$0xff]  }
  0xf8   : > { %3325 = vmatpush3.bf16.msra.mxu0 %v3654_v18  ;;  %1837 = vmatpush2.bf16.msra.mxu1 %v3647_v19  ;;  %v4790_v18 = vld [vmem:[%s4540_s21 + $0x164] ss:$8 sps:$4 sm:$0xff]   ;;  %v3742_v19 = vld [vmem:[%s4540_s21 + $0x80] ss:$8 sps:$4 sm:$0xff]  }
  0xf9   : > { %3326 = vmatprep.subr.bf16.mxu0 %v3664_v20  ;;  %1838 = vmatprep.subr.bf16.mxu1 %v3657_v21  ;;  %v4794_v20 = vld [vmem:[%s4540_s21 + $0x160] ss:$8 sps:$4 sm:$0xff]   ;;  %v4799_v21 = vld [vmem:[%s4540_s21 + $0x154] ss:$8 sps:$4 sm:$0xff]  }
  0xfb   : > { %968 = vmatmul.mubr.bf16.gmra.mxu0 %v4601_v46  ;;  %1111 = vmatmul.mubr.bf16.gmra.mxu1 %v4667_v22 }
  0xfc   : > { %977 = vmatprep.mubr.bf16.mxu0 %v4608_v51  ;;  %1839 = vmatpush2.bf16.msra.mxu1 %v3655_v23  ;;  %v4807_v23 = vld [vmem:[%s4540_s21 + $0x144] ss:$8 sps:$4 sm:$0xff]  }
  0xfd   : > { %1118 = vmatprep.mubr.bf16.mxu1 %v4672_v25  ;;  %1840 = vmatprep.subr.bf16.mxu1 %v3660_v24  ;;  %v4810_v24 = vld [vmem:[%s4540_s21 + $0x140] ss:$8 sps:$4 sm:$0xff]  }
  0xfe   : > { %3327 = vmatpush3.bf16.msra.mxu0 %v3665_v26  ;;  %v4818_v26 = vld [vmem:[%s4540_s21 + $0x130] ss:$8 sps:$4 sm:$0xff]  }
  0xff   : > { %3328 = vmatprep.subr.bf16.mxu0 %v3675_v27  ;;  %5629 = vst [vmem:[#allocation28_spill] sm:$0xff] %v4818_v26  ;;  %v4823_v27 = vld [vmem:[%s4540_s21 + $0x124] ss:$8 sps:$4 sm:$0xff]  }
 0x100   : > { %1841 = vmatpush2.bf16.msra.mxu1 %v3658_v28  ;;  %5630 = vst [vmem:[#allocation29_spill] sm:$0xff] %v4823_v27  ;;  %v4826_v28 = vld [vmem:[%s4540_s21 + $0x120] ss:$8 sps:$4 sm:$0xff]  }
 0x101   : > { %1842 = vmatprep.subr.bf16.mxu1 %v3668_v29  ;;  %5631 = vst [vmem:[#allocation30_spill] sm:$0xff] %v4826_v28  ;;  %v562_v29 = vlaneseq }
 0x102   : > { %3329 = vmatpush3.bf16.msra.mxu0 %v3676_v32  ;;  %v4834_v32 = vld [vmem:[%s4540_s21 + $0x110] ss:$8 sps:$4 sm:$0xff]  }
 0x103   : > { %978 = vmatmul.mubr.bf16.gmra.mxu0 %v4617_v56  ;;  %3330 = vmatprep.subr.bf16.mxu0 %v3683_v34  ;;  %5633 = vst [vmem:[#allocation32_spill] sm:$0xff] %v4834_v32  ;;  %v495_v34 = vld [vmem:[%s378_s30] sm:$0x7] }
 0x104   : > { %1119 = vmatmul.mubr.bf16.gmra.mxu1 %v4683_v30  ;;  %987 = vmatprep.mubr.bf16.mxu0 %v4624_v61 }
 0x105   : > { %1843 = vmatpush2.bf16.msra.mxu1 %v3666_v33  ;;  %1126 = vmatprep.mubr.bf16.mxu1 %v4690_v37  ;;  %v4837_v33 = vshrl.u32 %v562_v29, 7 }
 0x106   : > { %1844 = vmatprep.subr.bf16.mxu1 %v3671_v36  ;;  %3331 = vmatpush3.bf16.msra.mxu0 %v3684_v38  ;;  %v4843_v36 = vld [vmem:[%s4540_s21 + $0x104] ss:$8 sps:$4 sm:$0xff]   ;;  %v4847_v38 = vunpack.c.l.bf16 %v495_v34 }
 0x107   : > { %3332 = vmatprep.subr.bf16.mxu0 %v3685_v40  ;;  %5634 = vst [vmem:[#allocation33_spill] sm:$0xff] %v4837_v33  ;;  %5635 = vst [vmem:[#allocation34_spill] sm:$0xff] %v4843_v36  ;;  %v5556_v40 = vmov 0  }
 0x109   : > { %1845 = vmatpush2.bf16.msra.mxu1 %v3669_v39  ;;  %v572_v39 = vsub.s32 4, %v4837_v33 }
 0x10a   : > { %1846 = vmatprep.subr.bf16.mxu1 %v3679_v42  ;;  %3333 = vmatpush3.bf16.msra.mxu0 %v3686_v43  ;;  %v4852_v43 = vsub.s32 0, %v4837_v33 }
 0x10b   : > { %988 = vmatmul.mubr.bf16.gmra.mxu0 %v4632_v1  ;;  %3334 = vmatprep.subr.bf16.mxu0 %v3687_v44  ;;  %v573_v44 = vrot.slane %v4847_v38, %v572_v39 }
 0x10c   : > { %1127 = vmatmul.mubr.bf16.gmra.mxu1 %v4703_v45  ;;  %997 = vmatprep.mubr.bf16.mxu0 %v4640_v7  ;;  %5636 = vst [vmem:[#allocation35_spill] sm:$0xff] %v4852_v43 }
 0x10d   : > { %1847 = vmatpush2.bf16.msra.mxu1 %v3677_v47  ;;  %1850 = vmatprep.mubr.bf16.mxu1 %v4576_v31 }
 0x10e   : > { %1848 = vmatprep.subr.bf16.mxu1 %v3682_v48  ;;  %3335 = vmatpush3.bf16.msra.mxu0 %v3688_v49  ;;  %v4856_v48 = vrot.slane %v573_v44, %v4852_v43 }
 0x10f   : > { %3336 = vmatprep.subr.bf16.mxu0 %v3689_v50 }
 0x111   : > { %1849 = vmatpush2.bf16.msra.mxu1 %v3680_v52 }
 0x112   : > { %3337 = vmatpush3.bf16.msra.mxu0 %v3690_v53  ;;  %2420 = vmatprep.subr.bf16.mxu1 %v3693_v54 }
 0x113   : > { %998 = vmatmul.mubr.bf16.gmra.mxu0 %v4649_v12  ;;  %2533 = vmatprep.subr.bf16.mxu0 %v3729_v15 }
 0x114   : > { %1851 = vmatmul.mubr.bf16.vlgmr.msra.gmra.mxu1 %v4583_v35  ;;  %1007 = vmatprep.mubr.bf16.mxu0 %v4655_v16 }
 0x115   : > { %1860 = vmatprep.mubr.bf16.mxu1 %v4592_v41  ;;  %2421 = vmatpush1.bf16.msra.mxu1 %v3691_v55 }
 0x116   : > { %2422 = vmatprep.subr.bf16.mxu1 %v3696_v57 }
 0x119   : > { %2423 = vmatpush1.bf16.msra.mxu1 %v3694_v58 }
 0x11a   : > { %2424 = vmatprep.subr.bf16.mxu1 %v3699_v59 }
 0x11b   : > { %1008 = vmatmul.mubr.bf16.gmra.mxu0 %v4667_v22 }
 0x11c   : > { %1861 = vmatmul.mubr.bf16.gmra.mxu1 %v4601_v46  ;;  %1017 = vmatprep.mubr.bf16.mxu0 %v4672_v25 }
 0x11d   : > { %1870 = vmatprep.mubr.bf16.mxu1 %v4608_v51  ;;  %2425 = vmatpush1.bf16.msra.mxu1 %v3697_v60 }
 0x11e   : > { %2426 = vmatprep.subr.bf16.mxu1 %v3702_v62 }
 0x121   : > { %2427 = vmatpush1.bf16.msra.mxu1 %v3700_v63 }
 0x122   : > { %2428 = vmatprep.subr.bf16.mxu1 %v3705_v0 }
 0x123   : > { %1018 = vmatmul.mubr.bf16.gmra.mxu0 %v4683_v30 }
 0x124   : > { %1871 = vmatmul.mubr.bf16.gmra.mxu1 %v4617_v56  ;;  %1027 = vmatprep.mubr.bf16.mxu0 %v4690_v37 }
 0x125   : > { %1880 = vmatprep.mubr.bf16.mxu1 %v4624_v61 }
 0x12b   : > { %1028 = vmatmul.mubr.bf16.gmra.mxu0 %v4703_v45 }
 0x12c   : > { %1881 = vmatmul.mubr.bf16.gmra.mxu1 %v4632_v1  ;;  %1963 = vmatprep.mubr.bf16.mxu0 %v4576_v31  ;;  %v3703_v31 = vld [vmem:[%s4540_s21 + $0x30] ss:$8 sps:$4 sm:$0xff]  }
 0x12d   : > { %1890 = vmatprep.mubr.bf16.mxu1 %v4640_v7  ;;  %2429 = vmatpush1.bf16.msra.mxu1 %v3703_v31 }
 0x12e   : > { %2430 = vmatprep.subr.bf16.mxu1 %v3708_v2 }
 0x131   : > { %2431 = vmatpush1.bf16.msra.mxu1 %v3706_v3 }
 0x133   : > { %1964 = vmatmul.mubr.bf16.vlgmr.msra.gmra.mxu0 %v4583_v35  ;;  %v3711_v35 = vld [vmem:[%s4540_s21 + $0x14] ss:$8 sps:$4 sm:$0xff]  }
 0x134   : > { %1891 = vmatmul.mubr.bf16.gmra.mxu1 %v4649_v12  ;;  %1971 = vmatprep.mubr.bf16.mxu0 %v4592_v41  ;;  %v3709_v41 = vld [vmem:[%s4540_s21 + $0x10] ss:$8 sps:$4 sm:$0xff]  }
 0x135   : > { %1900 = vmatprep.mubr.bf16.mxu1 %v4655_v16  ;;  %2432 = vmatprep.subr.bf16.mxu1 %v3711_v35 }
 0x136   : > { %2433 = vmatpush1.bf16.msra.mxu1 %v3709_v41 }
 0x137   : > { %2434 = vmatprep.subr.bf16.mxu1 %v3714_v4 }
 0x13a   : > { %2435 = vmatpush1.bf16.msra.mxu1 %v3712_v5 }
 0x13b   : > { %1972 = vmatmul.mubr.bf16.gmra.mxu0 %v4601_v46  ;;  %v3717_v46 = vld [vmem:[%s4540_s21 + $0xf4] ss:$8 sps:$4 sm:$0xff]  }
 0x13c   : > { %1901 = vmatmul.mubr.bf16.gmra.mxu1 %v4667_v22  ;;  %1979 = vmatprep.mubr.bf16.mxu0 %v4608_v51  ;;  %v3715_v51 = vld [vmem:[%s4540_s21 + $0xf0] ss:$8 sps:$4 sm:$0xff]  }
 0x13d   : > { %1910 = vmatprep.mubr.bf16.mxu1 %v4672_v25  ;;  %2436 = vmatprep.subr.bf16.mxu1 %v3717_v46 }
 0x13e   : > { %2437 = vmatpush2.bf16.msra.mxu1 %v3715_v51 }
 0x143   : > { %1980 = vmatmul.mubr.bf16.gmra.mxu0 %v4617_v56  ;;  %v3720_v56 = vld [vmem:[%s4540_s21 + $0xe4] ss:$8 sps:$4 sm:$0xff]  }
 0x144   : > { %1911 = vmatmul.mubr.bf16.gmra.mxu1 %v4683_v30  ;;  %1987 = vmatprep.mubr.bf16.mxu0 %v4624_v61  ;;  %v3723_v61 = vld [vmem:[%s4540_s21 + $0xd4] ss:$8 sps:$4 sm:$0xff]  }
 0x145   : > { %1920 = vmatprep.mubr.bf16.mxu1 %v4690_v37  ;;  %2438 = vmatprep.subr.bf16.mxu1 %v3720_v56  ;;  %v5555_v56 = vsub.s32 2, %v4837_v33 }
 0x146   : > { %2439 = vmatpush2.bf16.msra.mxu1 %v3718_v6 }
 0x147   : > { %2440 = vmatprep.subr.bf16.mxu1 %v3723_v61 }
 0x14a   : > { %2441 = vmatpush2.bf16.msra.mxu1 %v3721_v8 }
 0x14b   : > { %1988 = vmatmul.mubr.bf16.gmra.mxu0 %v4632_v1  ;;  %v3726_v1 = vld [vmem:[%s4540_s21 + $0xc4] ss:$8 sps:$4 sm:$0xff]  }
 0x14c   : > { %1921 = vmatmul.mubr.bf16.gmra.mxu1 %v4703_v45  ;;  %1995 = vmatprep.mubr.bf16.mxu0 %v4640_v7  ;;  %v3732_v7 = vld [vmem:[%s4540_s21 + $0xb4] ss:$8 sps:$4 sm:$0xff]  }
 0x14d   : > { %2442 = vmatprep.subr.bf16.mxu1 %v3726_v1  ;;  %v565_v1 = vrot.slane %v4847_v38, %v4852_v43 }
 0x14e   : > { %2443 = vmatpush2.bf16.msra.mxu1 %v3724_v9 }
 0x14f   : > { %2444 = vmatprep.subr.bf16.mxu1 %v3732_v7 }
 0x152   : > { %2445 = vmatpush2.bf16.msra.mxu1 %v3730_v10  ;;  %v569_v10 = vrot.slane %v4847_v38, %v5555_v56 }
 0x153   : > { %1996 = vmatmul.mubr.bf16.gmra.mxu0 %v4649_v12  ;;  %v3733_v12 = vld [vmem:[%s4540_s21 + $0xa0] ss:$8 sps:$4 sm:$0xff]   ;;  %2446 = vmatprep.subr.bf16.mxu1 %v3735_v11 }
 0x154   : > { %2003 = vmatprep.mubr.bf16.mxu0 %v4655_v16  ;;  %v4785_v16 = vld [vmem:[%s4540_s21 + $0x170] ss:$8 sps:$4 sm:$0xff]   ;;  %v4895_v34 = vrot.slane %v569_v10, %v4852_v43 }
 0x155   : > { %2534 = vmatpush1.bf16.msra.mxu0 %v4785_v16 }
 0x156   : > { %2447 = vmatpush2.bf16.msra.mxu1 %v3733_v12  ;;  %2535 = vmatprep.subr.bf16.mxu0 %v4790_v18 }
 0x157   : > { %2448 = vmatprep.subr.bf16.mxu1 %v3741_v13 }
 0x159   : > { %2536 = vmatpush1.bf16.msra.mxu0 %v4794_v20 }
 0x15a   : > { %2449 = vmatpush2.bf16.msra.mxu1 %v3739_v14  ;;  %2537 = vmatprep.subr.bf16.mxu0 %v4799_v21  ;;  %v4888_v14 = vrot.slane %v565_v1, %v4852_v43 }
 0x15b   : > { %2004 = vmatmul.mubr.bf16.gmra.mxu0 %v4667_v22  ;;  %2450 = vmatprep.subr.bf16.mxu1 %v3744_v17  ;;  %v4802_v22 = vld [vmem:[%s4540_s21 + $0x150] ss:$8 sps:$4 sm:$0xff]  }
 0x15c   : > { %2011 = vmatprep.mubr.bf16.mxu0 %v4672_v25  ;;  %v4815_v25 = vld [vmem:[%s4540_s21 + $0x134] ss:$8 sps:$4 sm:$0xff]  }
 0x15d   : > { %2538 = vmatpush1.bf16.msra.mxu0 %v4802_v22  ;;  %5628 = vst [vmem:[#allocation27_spill] sm:$0xff] %v4815_v25 }
 0x15e   : > { %2451 = vmatpush2.bf16.msra.mxu1 %v3742_v19  ;;  %2539 = vmatprep.subr.bf16.mxu0 %v4807_v23 }
 0x15f   : > { %3386 = vmatprep.subr.bf16.mxu1 %v3729_v15 }
 0x161   : > { %2540 = vmatpush1.bf16.msra.mxu0 %v4810_v24 }
 0x162   : > { %2541 = vmatprep.subr.bf16.mxu0 %v4815_v25 }
 0x163   : > { %2012 = vmatmul.mubr.bf16.gmra.mxu0 %v4683_v30  ;;  %v4831_v30 = vld [vmem:[%s4540_s21 + $0x114] ss:$8 sps:$4 sm:$0xff]  }
 0x164   : > { %2019 = vmatprep.mubr.bf16.mxu0 %v4690_v37  ;;  %5632 = vst [vmem:[#allocation31_spill] sm:$0xff] %v4831_v30  ;;  %v3760_v37 = vld [vmem:[%s4540_s21 + $0x100] ss:$8 sps:$4 sm:$0xff]  }
 0x165   : > { %2542 = vmatpush1.bf16.msra.mxu0 %v4818_v26 }
 0x166   : > { %2543 = vmatprep.subr.bf16.mxu0 %v4823_v27 }
 0x169   : > { %2544 = vmatpush1.bf16.msra.mxu0 %v4826_v28 }
 0x16a   : > { %2545 = vmatprep.subr.bf16.mxu0 %v4831_v30 }
 0x16b   : > { %2020 = vmatmul.mubr.bf16.gmra.mxu0 %v4703_v45 }
 0x16c   : > { %2565 = vmatprep.mubr.bf16.mxu0 %v5556_v40 }
 0x16d   : > { %2546 = vmatpush1.bf16.msra.mxu0 %v4834_v32 }
 0x16e   : > { %2547 = vmatprep.subr.bf16.mxu0 %v4843_v36 }
 0x171   : > { %2548 = vmatpush1.bf16.msra.mxu0 %v3760_v37 }
 0x193   : > { %v3274_v42 = vpop.f32.mrf.mxu1 }
 0x195   : > { %v3275_v45 = vpop.f32.mrf.mxu1 }
 0x196   : > { %v3276_v49 = vadd.f32 %v3275_v45, %v3274_v42 }
 0x197   : > { %v3277_v47 = vpop.f32.mrf.mxu1 }
 0x198   : > { %v4859_v53 = vadd.f32 %v3276_v49, %v4856_v48 }
 0x199   : > { %v3278_v50 = vpop.f32.mrf.mxu1 }
 0x19a   : > { %v3279_v54 = vadd.f32 %v3278_v50, %v3277_v47  ;;  %v3099_v59 = vmul.f32 -1.442695, %v4859_v53 }
 0x19b   : > { %v3280_v52 = vpop.f32.mrf.mxu1 }
 0x19c   : > { %v4863_v60 = vadd.f32 %v3279_v54, %v4856_v48  ;;  %3763 = vpow2.f32 %v3099_v59 }
 0x19d   : > { %v3281_v55 = vpop.f32.mrf.mxu1 }
 0x19e   : > { %v3282_v57 = vadd.f32 %v3281_v55, %v3280_v52  ;;  %v3102_v2 = vmul.f32 -1.442695, %v4863_v60 }
 0x19f   : > { %v3283_v58 = vpop.f32.mrf.mxu1 }
 0x1a0   : > { %v4866_v0 = vadd.f32 %v3282_v57, %v4856_v48  ;;  %3765 = vpow2.f32 %v3102_v2 }
 0x1a1   : > { %v3284_v62 = vpop.f32.mrf.mxu1 }
 0x1a2   : > { %v3285_v63 = vadd.f32 %v3284_v62, %v3283_v58  ;;  %v3105_v41 = vmul.f32 -1.442695, %v4866_v0 }
 0x1a3   : > { %v3286_v31 = vpop.f32.mrf.mxu1 }
 0x1a4   : > { %v4870_v3 = vadd.f32 %v3285_v63, %v4856_v48  ;;  %3767 = vpow2.f32 %v3105_v41 }
 0x1a5   : > { %v3287_v35 = vpop.f32.mrf.mxu1 }
 0x1a6   : > { %v3288_v4 = vadd.f32 %v3287_v35, %v3286_v31  ;;  %v3108_v46 = vmul.f32 -1.442695, %v4870_v3 }
 0x1a7   : > { %v3289_v5 = vpop.f32.mrf.mxu1 }
 0x1a8   : > { %v4876_v61 = vadd.f32 %v3288_v4, %v4856_v48  ;;  %3769 = vpow2.f32 %v3108_v46 }
 0x1a9   : > { %v3290_v51 = vpop.f32.mrf.mxu1  ;;  %v3764_v17 = vpop.eup %3763 }
 0x1aa   : > { %v3291_v6 = vadd.f32 %v3290_v51, %v3289_v5  ;;  %5637 = vst [vmem:[#allocation36_spill] sm:$0xff] %v4876_v61  ;;  %v3111_v12 = vmul.f32 -1.442695, %v4876_v61  ;;  %v1281_v45 = vadd.f32 1.0, %v3764_v17 }
 0x1ab   : > { %v3292_v8 = vpop.f32.mrf.mxu1 }
 0x1ac   : > { %v4881_v9 = vadd.f32 %v3291_v6, %v4856_v48  ;;  %3771 = vpow2.f32 %v3111_v12 }
 0x1ad   : > { %v3293_v7 = vpop.f32.mrf.mxu1  ;;  %v3766_v49 = vpop.eup %3765 }
 0x1ae   : > { %5638 = vst [vmem:[#allocation37_spill] sm:$0xff] %v4881_v9  ;;  %v3294_v11 = vadd.f32 %v3293_v7, %v3292_v8  ;;  %v3114_v15 = vmul.f32 -1.442695, %v4881_v9  ;;  %v1284_v2 = vadd.f32 1.0, %v3766_v49 }
 0x1af   : > { %v3295_v13 = vpop.f32.mrf.mxu1 }
 0x1b0   : > { %v4892_v19 = vadd.f32 %v3294_v11, %v4856_v48  ;;  %3773 = vpow2.f32 %v3114_v15 }
 0x1b1   : > { %v3296_v29 = vpop.f32.mrf.mxu1  ;;  %v3768_v31 = vpop.eup %3767 }
 0x1b2   : > { %5639 = vst [vmem:[#allocation38_spill] sm:$0xff] %v4892_v19  ;;  %v3297_v37 = vadd.f32 %v3296_v29, %v3295_v13  ;;  %v3117_v50 = vmul.f32 -1.442695, %v4892_v19  ;;  %v1287_v7 = vadd.f32 1.0, %v3768_v31 }
 0x1b3   : > { %v959_v39 = vpop.f32.mrf.mxu0  ;;  %v3298_v44 = vpop.f32.mrf.mxu1 }
 0x1b4   : > { %v4898_v42 = vadd.f32 %v959_v39, %v4888_v14  ;;  %v4902_v52 = vadd.f32 %v3297_v37, %v4856_v48 }
 0x1b5   : > { %v961_v47 = vpop.f32.mrf.mxu0  ;;  %v3299_v57 = vpop.f32.mrf.mxu1 }
 0x1b6   : > { %5640 = vst [vmem:[#allocation39_spill] sm:$0xff] %v4902_v52  ;;  %v3097_v54 = vmul.f32 -1.442695, %v4898_v42  ;;  %v4906_v55 = vadd.f32 %v961_v47, %v4895_v34  ;;  %v3300_v35 = vadd.f32 %v3299_v57, %v3298_v44  ;;  %v3770_v4 = vpop.eup %3769  ;;  %v3120_v5 = vmul.f32 -1.442695, %v4902_v52 }
 0x1b7   : > { %v963_v58 = vpop.f32.mrf.mxu0  ;;  %v3301_v63 = vpop.f32.mrf.mxu1  ;;  %v1290_v13 = vadd.f32 1.0, %v3770_v4  ;;  %v1541_v52 = vsub.s32 3, %v4837_v33 }
 0x1b8   : > { %3775 = vpow2.f32 %v3097_v54  ;;  %v3098_v59 = vmul.f32 -1.442695, %v4906_v55  ;;  %v4910_v62 = vadd.f32 %v963_v58, %v4888_v14  ;;  %v4922_v15 = vadd.f32 %v3300_v35, %v4856_v48 }
 0x1b9   : > { %3777 = vrcp.f32 %v1281_v45  ;;  %v965_v41 = vpop.f32.mrf.mxu0  ;;  %v3302_v6 = vpop.f32.mrf.mxu1 }
 0x1ba   : > { %3779 = vpow2.f32 %v3117_v50  ;;  %v3100_v46 = vmul.f32 -1.442695, %v4910_v62  ;;  %v4915_v51 = vadd.f32 %v965_v41, %v4895_v34  ;;  %v3303_v8 = vadd.f32 %v3302_v6, %v3301_v63  ;;  %5641 = vst [vmem:[#allocation40_spill] sm:$0xff] %v4922_v15  ;;  %v3772_v57 = vpop.eup %3771 }
 0x1bb   : > { %3781 = vpow2.f32 %v3098_v59  ;;  %v969_v1 = vpop.f32.mrf.mxu0  ;;  %v3304_v12 = vpop.f32.mrf.mxu1  ;;  %v3123_v58 = vmul.f32 -1.442695, %v4922_v15 }
 0x1bc   : > { %3783 = vpow2.f32 %v3100_v46  ;;  %v3101_v10 = vmul.f32 -1.442695, %v4915_v51  ;;  %v4919_v11 = vadd.f32 %v969_v1, %v4888_v14  ;;  %v4925_v17 = vadd.f32 %v3303_v8, %v4856_v48 }
 0x1bd   : > { %3785 = vrcp.f32 %v1284_v2  ;;  %v971_v29 = vpop.f32.mrf.mxu0  ;;  %v3305_v44 = vpop.f32.mrf.mxu1  ;;  %v1293_v46 = vadd.f32 1.0, %v3772_v57 }
 0x1be   : > { %5642 = vst [vmem:[#allocation41_spill] sm:$0xff] %v4925_v17  ;;  %3787 = vpow2.f32 %v3120_v5  ;;  %v3103_v37 = vmul.f32 -1.442695, %v4919_v11  ;;  %v4929_v39 = vadd.f32 %v971_v29, %v4895_v34  ;;  %v3306_v45 = vadd.f32 %v3305_v44, %v3304_v12  ;;  %v3774_v31 = vpop.eup %3773 }
 0x1bf   : > { %3789 = vpow2.f32 %v3101_v10  ;;  %v973_v47 = vpop.f32.mrf.mxu0  ;;  %v3307_v54 = vpop.f32.mrf.mxu1  ;;  %v3126_v59 = vmul.f32 -1.442695, %v4925_v17 }
 0x1c0   : > { %3791 = vrcp.f32 %v1287_v7  ;;  %v3104_v49 = vmul.f32 -1.442695, %v4929_v39  ;;  %v4933_v50 = vadd.f32 %v973_v47, %v4888_v14  ;;  %v4938_v2 = vadd.f32 %v3306_v45, %v4856_v48 }
 0x1c1   : > { %3793 = vrcp.f32 %v1290_v13  ;;  %v975_v63 = vpop.f32.mrf.mxu0  ;;  %v3308_v4 = vpop.f32.mrf.mxu1  ;;  %v1296_v7 = vadd.f32 1.0, %v3774_v31 }
 0x1c2   : > { %3795 = vpow2.f32 %v3103_v37  ;;  %5643 = vst [vmem:[#allocation42_spill] sm:$0xff] %v4938_v2  ;;  %v3106_v35 = vmul.f32 -1.442695, %v4933_v50  ;;  %v4942_v41 = vadd.f32 %v975_v63, %v4895_v34  ;;  %v3309_v10 = vadd.f32 %v3308_v4, %v3307_v54 }
 0x1c3   : > { %3797 = vpow2.f32 %v3104_v49  ;;  %v979_v5 = vpop.f32.mrf.mxu0  ;;  %v3129_v29 = vmul.f32 -1.442695, %v4938_v2 }
 0x1c4   : > { %3799 = vpow2.f32 %v3106_v35  ;;  %v3107_v6 = vmul.f32 -1.442695, %v4942_v41  ;;  %v4945_v8 = vpop.f32.mrf.mxu1  ;;  %v4951_v37 = vadd.f32 %v979_v5, %v4888_v14 }
 0x1c5   : > { %v3776_v1 = vpop.eup %3775  ;;  %3801 = vpow2.f32 %v3123_v58  ;;  %v981_v12 = vpop.f32.mrf.mxu0 }
 0x1c6   : > { %v4947_v13 = vpop.eup %3777  ;;  %3803 = vpow2.f32 %v3126_v59  ;;  %v4953_v44 = vpop.f32.mrf.mxu1  ;;  %v1279_v47 = vadd.f32 1.0, %v3776_v1  ;;  %v4958_v59 = vadd.f32 %v3309_v10, %v4856_v48  ;;  %v3109_v5 = vmul.f32 -1.442695, %v4951_v37 }
 0x1c7   : > { %v3780_v45 = vpop.eup %3779  ;;  %3805 = vpow2.f32 %v3107_v6  ;;  %v983_v49 = vpop.f32.mrf.mxu0  ;;  %v4964_v6 = vadd.f32 %v981_v12, %v4895_v34 }
 0x1c8   : > { %v3782_v57 = vpop.eup %3781  ;;  %3807 = vrcp.f32 %v1293_v46  ;;  %v4955_v63 = vpop.f32.mrf.mxu1  ;;  %5644 = vst [vmem:[#allocation43_spill] sm:$0xff] %v4958_v59 }
 0x1c9   : > { %v3784_v54 = vpop.eup %3783  ;;  %3809 = vrcp.f32 %v1296_v7  ;;  %v1280_v58 = vadd.f32 1.0, %v3782_v57  ;;  %v985_v31 = vpop.f32.mrf.mxu0  ;;  %5645 = vst [vmem:[#allocation44_spill] sm:$0xff] %v4964_v6  ;;  %v1299_v57 = vadd.f32 1.0, %v3780_v45  ;;  %v3110_v12 = vmul.f32 -1.442695, %v4964_v6 }
 0x1ca   : > { %v4960_v35 = vpop.eup %3785  ;;  %v1282_v4 = vadd.f32 1.0, %v3784_v54  ;;  %3811 = vpow2.f32 %v3129_v29  ;;  %v4966_v1 = vpop.f32.mrf.mxu1  ;;  %v3132_v29 = vmul.f32 -1.442695, %v4958_v59  ;;  %v4987_v32 = vadd.f32 %v985_v31, %v4895_v34 }
 0x1cb   : > { %v3788_v46 = vpop.eup %3787  ;;  %3813 = vrcp.f32 %v1279_v47  ;;  %v989_v56 = vpop.f32.mrf.mxu0 }
 0x1cc   : > { %v3790_v7 = vpop.eup %3789  ;;  %3815 = vrcp.f32 %v1282_v4  ;;  %v4968_v10 = vpop.f32.mrf.mxu1  ;;  %v1302_v15 = vadd.f32 1.0, %v3788_v46  ;;  %v1537_v4 = vsub.s32 1, %v4837_v33 }
 0x1cd   : > { %v4970_v40 = vpop.eup %3791  ;;  %3817 = vrcp.f32 %v1280_v58  ;;  %v1283_v54 = vadd.f32 1.0, %v3790_v7  ;;  %v991_v43 = vpop.f32.mrf.mxu0  ;;  %v4981_v7 = vadd.f32 %v983_v49, %v4888_v14 }
 0x1ce   : > { %v4973_v2 = vpop.eup %3793  ;;  %3819 = vpow2.f32 %v3109_v5  ;;  %v4976_v17 = vpop.f32.mrf.mxu1  ;;  %v1545_v5 = vsub.s32 5, %v4837_v33  ;;  %v1538_v28 = vrot.slane %v4847_v38, %v1537_v4  ;;  %v1542_v33 = vrot.slane %v4847_v38, %v1541_v52 }
 0x1cf   : > { %v3796_v47 = vpop.eup %3795  ;;  %3821 = vrcp.f32 %v1283_v54  ;;  %v993_v45 = vpop.f32.mrf.mxu0  ;;  %5646 = vst [vmem:[#allocation45_spill] sm:$0xff] %v4981_v7  ;;  %v5001_v26 = vadd.f32 %v991_v43, %v4895_v34 }
 0x1d0   : > { %v3798_v58 = vpop.eup %3797  ;;  %3823 = vrcp.f32 %v1299_v57  ;;  %v4983_v59 = vpop.f32.mrf.mxu1  ;;  %v1285_v54 = vadd.f32 1.0, %v3796_v47  ;;  %v4995_v47 = vadd.f32 %v989_v56, %v4888_v14  ;;  %v1546_v31 = vrot.slane %v4847_v38, %v1545_v5 }
 0x1d1   : > { %v3800_v19 = vpop.eup %3799  ;;  %v1286_v61 = vadd.f32 1.0, %v3798_v58  ;;  %3825 = vpow2.f32 %v3132_v29  ;;  %v995_v9 = vpop.f32.mrf.mxu0  ;;  %v3112_v29 = vmul.f32 -1.442695, %v4981_v7  ;;  %5649 = vst [vmem:[#allocation48_spill] sm:$0xff] %v5001_v26  ;;  %v3113_v56 = vmul.f32 -1.442695, %v4987_v32 }
 0x1d2   : > { %v3802_v46 = vpop.eup %3801  ;;  %v1288_v36 = vadd.f32 1.0, %v3800_v19  ;;  %3827 = vpow2.f32 %v3110_v12  ;;  %v4989_v30 = vpop.f32.mrf.mxu1  ;;  %5647 = vst [vmem:[#allocation46_spill] sm:$0xff] %v4995_v47  ;;  %v5009_v5 = vadd.f32 %v993_v45, %v4888_v14  ;;  %v5020_v45 = vrot.slane %v1546_v31, %v1537_v4 }
 0x1d3   : > { %v3804_v57 = vpop.eup %3803  ;;  %3829 = vrcp.f32 %v1302_v15  ;;  %v999_v49 = vpop.f32.mrf.mxu0  ;;  %v1305_v58 = vadd.f32 1.0, %v3802_v46  ;;  %v3115_v46 = vmul.f32 -1.442695, %v4995_v47 }
 0x1d4   : > { %v3806_v27 = vpop.eup %3805  ;;  %3831 = vrcp.f32 %v1286_v61  ;;  %v1852_v19 = vpop.f32.mrf.mxu1  ;;  %v3312_v61 = vadd.f32 %v4953_v44, %v4945_v8  ;;  %v1308_v38 = vadd.f32 1.0, %v3804_v57  ;;  %v5018_v57 = vrot.slane %v1542_v33, %v1537_v4  ;;  %5651 = vst [vmem:[#allocation50_spill] sm:$0xff] %v5020_v45 }
 0x1d5   : > { %v4998_v12 = vpop.eup %3807  ;;  %3833 = vrcp.f32 %v1288_v36  ;;  %v1289_v15 = vadd.f32 1.0, %v3806_v27  ;;  %v1001_v25 = vpop.f32.mrf.mxu0  ;;  %v5012_v27 = vadd.f32 %v995_v9, %v4895_v34  ;;  %v5024_v9 = vmul.f32 %v4947_v13, %v4859_v53 }
 0x1d6   : > { %5648 = vst [vmem:[#allocation47_spill] sm:$0xff] %v4998_v12  ;;  %v5003_v52 = vpop.eup %3809  ;;  %3835 = vrcp.f32 %v1285_v54  ;;  %v1854_v7 = vpop.f32.mrf.mxu1  ;;  %v5015_v54 = vrot.slane %v1538_v28, %v1537_v4  ;;  %v3116_v12 = vmul.f32 -1.442695, %v5001_v26  ;;  %v5031_v33 = vadd.f32 %v3312_v61, %v4856_v48 }
 0x1d7   : > { %5650 = vst [vmem:[#allocation49_spill] sm:$0xff] %v5003_v52  ;;  %v3812_v6 = vpop.eup %3811  ;;  %3837 = vrcp.f32 %v1289_v15  ;;  %v1003_v36 = vpop.f32.mrf.mxu0  ;;  %v3118_v4 = vmul.f32 -1.442695, %v5009_v5  ;;  %v3119_v31 = vmul.f32 -1.442695, %v5012_v27 }
 0x1d8   : > { %v3814_v43 = vpop.eup %3813  ;;  %3839 = vpow2.f32 %v3112_v29  ;;  %v1856_v8 = vpop.f32.mrf.mxu1  ;;  %v5028_v29 = vmul.f32 %v4960_v35, %v4863_v60  ;;  %v1311_v28 = vadd.f32 1.0, %v3812_v6  ;;  %5653 = vst [vmem:[#allocation52_spill] sm:$0xff] %v5031_v33  ;;  %v5037_v60 = vadd.f32 %v999_v49, %v4888_v14 }
 0x1d9   : > { %v3816_v44 = vpop.eup %3815  ;;  %3841 = vrcp.f32 %v1305_v58  ;;  %v1005_v15 = vpop.f32.mrf.mxu0  ;;  %v1857_v13 = vadd.f32 %v1856_v8, %v5015_v54  ;;  %v1423_v49 = vmul.f32 %v3814_v43, %v4898_v42  ;;  %v1853_v8 = vadd.f32 %v1852_v19, %v5015_v54 }
 0x1da   : > { %v3818_v52 = vpop.eup %3817  ;;  %5652 = vst [vmem:[#allocation51_spill] sm:$0xff] %v5028_v29  ;;  %3843 = vpow2.f32 %v3113_v56  ;;  %v1858_v47 = vpop.f32.mrf.mxu1  ;;  %v1426_v53 = vmul.f32 %v3816_v44, %v4910_v62  ;;  %v5046_v56 = vadd.f32 %v1001_v25, %v4895_v34  ;;  %v1855_v25 = vadd.f32 %v1854_v7, %v5018_v57 }
 0x1db   : > { %v3820_v58 = vpop.eup %3819  ;;  %3845 = vrcp.f32 %v1308_v38  ;;  %v1009_v26 = vpop.f32.mrf.mxu0  ;;  %v1859_v38 = vadd.f32 %v1858_v47, %v5018_v57  ;;  %v5061_v47 = vadd.f32 %v1005_v15, %v4895_v34  ;;  %v5069_v42 = vmul.f32 %v4970_v40, %v4866_v0 }
 0x1dc   : > { %v3822_v45 = vpop.eup %3821  ;;  %3847 = vpow2.f32 %v3115_v46  ;;  %v5040_v35 = vpop.f32.mrf.mxu1  ;;  %5655 = vst [vmem:[#allocation54_spill] sm:$0xff] %v5046_v56  ;;  %v1291_v46 = vadd.f32 1.0, %v3820_v58  ;;  %v3121_v19 = vmul.f32 -1.442695, %v5037_v60  ;;  %v5073_v43 = vmul.f32 -1.442695, %v5031_v33 }
 0x1dd   : > { %v5042_v6 = vpop.eup %3823  ;;  %v1427_v61 = vmul.f32 %v3822_v45, %v4915_v51  ;;  %3849 = vpow2.f32 %v3116_v12  ;;  %v5049_v29 = vpop.f32.mrf.mxu0  ;;  %v1424_v51 = vmul.f32 %v3818_v52, %v4906_v55  ;;  %v5057_v12 = vadd.f32 %v1003_v36, %v4888_v14  ;;  %5657 = vst [vmem:[#allocation56_spill] sm:$0xff] %v5061_v47  ;;  %5659 = vst [vmem:[#allocation58_spill] sm:$0xff] %v5069_v42 }
 0x1de   : > { %5654 = vst [vmem:[#allocation53_spill] sm:$0xff] %v5042_v6  ;;  %v5051_v62 = vpop.eup %3825  ;;  %3851 = vrcp.f32 %v1311_v28  ;;  %v1864_v44 = vpop.f32.mrf.mxu1  ;;  %v2031_v55 = vmul.f32 %v1857_v13, %v1426_v53  ;;  %v3122_v7 = vmul.f32 -1.442695, %v5046_v56  ;;  %v3315_v40 = vadd.f32 %v4966_v1, %v4955_v63 }
 0x1df   : > { %5656 = vst [vmem:[#allocation55_spill] sm:$0xff] %v5051_v62  ;;  %v3828_v6 = vpop.eup %3827  ;;  %v5063_v45 = vpop.f32.mrf.mxu0  ;;  %3853 = vpow2.f32 %v3118_v4  ;;  %v2032_v15 = vmul.f32 %v1859_v38, %v1427_v61  ;;  %v2028_v0 = vmul.f32 %v1853_v8, %v1423_v49  ;;  %v3124_v13 = vmul.f32 -1.442695, %v5057_v12 }
 0x1e0   : > { %v5065_v62 = vpop.eup %3829  ;;  %v1866_v52 = vpop.f32.mrf.mxu1  ;;  %3855 = vpow2.f32 %v3119_v31  ;;  %v2029_v42 = vmul.f32 %v1855_v25, %v1424_v51  ;;  %v3125_v33 = vmul.f32 -1.442695, %v5061_v47  ;;  %v5083_v31 = vadd.f32 %v1009_v26, %v4888_v14 }
 0x1e1   : > { %5658 = vst [vmem:[#allocation57_spill] sm:$0xff] %v5065_v62  ;;  %v3832_v36 = vpop.eup %3831  ;;  %v5076_v28 = vpop.f32.mrf.mxu0  ;;  %3857 = vrcp.f32 %v1291_v46  ;;  %v1292_v62 = vadd.f32 1.0, %v3828_v6  ;;  %v2076_v6 = vpack.c.bf16 %v2031_v55, %v2028_v0  ;;  %v1865_v46 = vadd.f32 %v1864_v44, %v5018_v57 }
 0x1e2   : > { %v3834_v58 = vpop.eup %3833  ;;  %v1868_v4 = vpop.f32.mrf.mxu1  ;;  %v1430_v56 = vmul.f32 %v3832_v36, %v4929_v39  ;;  %3859 = vpow2.f32 %v3121_v19  ;;  %v2077_v51 = vpack.c.bf16 %v2032_v15, %v2029_v42  ;;  %v1867_v39 = vadd.f32 %v1866_v52, %v5015_v54 }
 0x1e3   : > { %v3836_v53 = vpop.eup %3835  ;;  %v1019_v61 = vpop.f32.mrf.mxu0  ;;  %v1432_v49 = vmul.f32 %v3834_v58, %v4933_v50  ;;  %3861 = vpow2.f32 %v3122_v7  ;;  %v1869_v19 = vadd.f32 %v1868_v4, %v5018_v57  ;;  %v5101_v50 = vadd.f32 %v3315_v40, %v4856_v48 }
 0x1e4   : > { %v3838_v38 = vpop.eup %3837  ;;  %v5087_v63 = vpop.f32.mrf.mxu1  ;;  %3863 = vrcp.f32 %v1292_v62  ;;  %v1429_v36 = vmul.f32 %v3836_v53, %v4919_v11  ;;  %2452 = vmatprep.mubr.bf16.mxu1 %v2077_v51  ;;  %v1863_v7 = vadd.f32 %v5040_v35, %v5015_v54  ;;  %v5113_v40 = vmul.f32 %v4973_v2, %v4870_v3 }
 0x1e5   : > { %v3840_v1 = vpop.eup %3839  ;;  %v1433_v8 = vmul.f32 %v3838_v38, %v4942_v41  ;;  %v5091_v25 = vpop.f32.mrf.mxu0  ;;  %5660 = vst [vmem:[#allocation59_spill] sm:$0xff] %v5101_v50  ;;  %v3318_v41 = vadd.f32 %v4976_v17, %v4968_v10  ;;  %3865 = vpow2.f32 %v3124_v13  ;;  %2453 = vmatmul.mubr.bf16.vlgmr.msra.gmra.mxu1 %v2076_v6  ;;  %v3127_v17 = vmul.f32 -1.442695, %v5083_v31 }
 0x1e6   : > { %v5093_v26 = vpop.eup %3841  ;;  %v1294_v47 = vadd.f32 1.0, %v3840_v1  ;;  %v5097_v44 = vpop.f32.mrf.mxu1  ;;  %v5118_v10 = vadd.f32 %v5049_v29, %v4895_v34  ;;  %3394 = vmatpush1.bf16.msra.mxu1 %v4785_v16  ;;  %v2035_v4 = vmul.f32 %v1865_v46, %v1430_v56  ;;  %v2037_v53 = vmul.f32 %v1867_v39, %v1432_v49 }
 0x1e7   : > { %v3844_v55 = vpop.eup %3843  ;;  %v1023_v42 = vpop.f32.mrf.mxu0  ;;  %v2038_v15 = vmul.f32 %v1869_v19, %v1433_v8  ;;  %3387 = vmatprep.subr.bf16.mxu1 %v4790_v18  ;;  %v3138_v2 = vmul.f32 -1.442695, %v5101_v50  ;;  %v3321_v56 = vadd.f32 %v4989_v30, %v4983_v59  ;;  %v2034_v38 = vmul.f32 %v1863_v7, %v1429_v36 }
 0x1e8   : > { %v5105_v62 = vpop.eup %3845  ;;  %3867 = vrcp.f32 %v1294_v47  ;;  %v1295_v52 = vadd.f32 1.0, %v3844_v55  ;;  %v5109_v58 = vpop.f32.mrf.mxu1  ;;  %v5141_v1 = vadd.f32 %v5076_v28, %v4895_v34  ;;  %v5144_v49 = vadd.f32 %v1019_v61, %v4888_v14 }
 0x1e9   : > { %v3848_v11 = vpop.eup %3847  ;;  %3869 = vpow2.f32 %v3125_v33  ;;  %v1025_v47 = vpop.f32.mrf.mxu0  ;;  %v5129_v33 = vadd.f32 %v3318_v41, %v4856_v48  ;;  %v2080_v6 = vpack.c.bf16 %v2038_v15, %v2035_v4  ;;  %v3128_v51 = vmul.f32 -1.442695, %v5118_v10 }
 0x1ea   : > { %v3850_v35 = vpop.eup %3849  ;;  %3871 = vrcp.f32 %v1295_v52  ;;  %v1297_v0 = vadd.f32 1.0, %v3848_v11  ;;  %v5121_v13 = vpop.f32.mrf.mxu1  ;;  %3395 = vmatpush1.bf16.msra.mxu1 %v4794_v20  ;;  %v2079_v39 = vpack.c.bf16 %v2037_v53, %v2034_v38  ;;  %v5153_v61 = vadd.f32 %v5091_v25, %v4895_v34 }
 0x1eb   : > { %v5124_v3 = vpop.eup %3851  ;;  %3873 = vpow2.f32 %v5073_v43  ;;  %v1298_v29 = vadd.f32 1.0, %v3850_v35  ;;  %5662 = vst [vmem:[#allocation61_spill] sm:$0xff] %v5129_v33  ;;  %v1029_v16 = vpop.f32.mrf.mxu0  ;;  %v5137_v43 = vadd.f32 %v5063_v45, %v4888_v14  ;;  %2462 = vmatprep.mubr.bf16.mxu1 %v2080_v6  ;;  %3388 = vmatprep.subr.bf16.mxu1 %v4799_v21  ;;  %v5156_v20 = vadd.f32 %v1023_v42, %v4888_v14 }
 0x1ec   : > { %5661 = vst [vmem:[#allocation60_spill] sm:$0xff] %v5124_v3  ;;  %3875 = vrcp.f32 %v1297_v0  ;;  %v5133_v46 = vpop.f32.mrf.mxu1  ;;  %v3854_v18 = vpop.eup %3853  ;;  %v5159_v36 = vmul.f32 -1.442695, %v5129_v33  ;;  %v5162_v41 = vadd.f32 %v3321_v56, %v4856_v48  ;;  %v5165_v21 = vadd.f32 %v1025_v47, %v4895_v34 }
 0x1ed   : > { %3877 = vrcp.f32 %v1298_v29  ;;  %v1031_v8 = vpop.f32.mrf.mxu0  ;;  %v3856_v30 = vpop.eup %3855  ;;  %v1300_v59 = vadd.f32 1.0, %v3854_v18  ;;  %2463 = vmatmul.mubr.bf16.gmra.mxu1 %v2079_v39  ;;  %v3130_v25 = vmul.f32 -1.442695, %v5137_v43  ;;  %v3131_v42 = vmul.f32 -1.442695, %v5141_v1 }
 0x1ee   : > { %3879 = vpow2.f32 %v3127_v17  ;;  %v5148_v19 = vpop.f32.mrf.mxu1  ;;  %v3858_v45 = vpop.eup %3857  ;;  %v1301_v28 = vadd.f32 1.0, %v3856_v30  ;;  %v3133_v15 = vmul.f32 -1.442695, %v5144_v49  ;;  %3396 = vmatpush1.bf16.msra.mxu1 %v4802_v22  ;;  %v1873_v47 = vadd.f32 %v5087_v63, %v5015_v54 }
 0x1ef   : > { %3881 = vpow2.f32 %v3138_v2  ;;  %v1033_v55 = vpop.f32.mrf.mxu0  ;;  %v3860_v7 = vpop.eup %3859  ;;  %v1435_v48 = vmul.f32 %v3858_v45, %v4951_v37  ;;  %3389 = vmatprep.subr.bf16.mxu1 %v4807_v23  ;;  %v3134_v2 = vmul.f32 -1.442695, %v5153_v61  ;;  %v3136_v29 = vmul.f32 -1.442695, %v5156_v20  ;;  %v5663_v45 = vld [vmem:[#allocation44_spill] sm:$0xff] }
 0x1f0   : > { %3883 = vrcp.f32 %v1300_v59  ;;  %v5167_v52 = vpop.f32.mrf.mxu1  ;;  %v3862_v17 = vpop.eup %3861  ;;  %v1303_v35 = vadd.f32 1.0, %v3860_v7  ;;  %v1875_v22 = vadd.f32 %v5097_v44, %v5018_v57  ;;  %v3137_v38 = vmul.f32 -1.442695, %v5165_v21 }
 0x1f1   : > { %3885 = vrcp.f32 %v1301_v28  ;;  %v1035_v11 = vpop.f32.mrf.mxu0  ;;  %v3864_v4 = vpop.eup %3863  ;;  %v1304_v53 = vadd.f32 1.0, %v3862_v17  ;;  %v1877_v63 = vadd.f32 %v5109_v58, %v5015_v54  ;;  %v5187_v6 = vadd.f32 %v1029_v16, %v4888_v14  ;;  %v5664_v28 = vld [vmem:[#allocation45_spill] sm:$0xff] }
 0x1f2   : > { %3887 = vpow2.f32 %v3128_v51  ;;  %v5176_v0 = vpop.f32.mrf.mxu1  ;;  %v3866_v37 = vpop.eup %3865  ;;  %v1879_v59 = vadd.f32 %v5121_v13, %v5018_v57  ;;  %v5194_v44 = vadd.f32 %v1031_v8, %v4895_v34  ;;  %3397 = vmatpush1.bf16.msra.mxu1 %v4810_v24  ;;  %v1436_v58 = vmul.f32 %v3864_v4, %v5663_v45 }
 0x1f3   : > { %v3338_v56 = vpop.f32.mrf.mxu0  ;;  %3889 = vrcp.f32 %v1303_v35  ;;  %v1306_v30 = vadd.f32 1.0, %v3866_v37  ;;  %v2040_v7 = vmul.f32 %v1873_v47, %v1435_v48  ;;  %v5665_v35 = vld [vmem:[#allocation27_spill] sm:$0xff]  ;;  %v5203_v8 = vadd.f32 %v1033_v55, %v4888_v14 }
 0x1f4   : > { %v5189_v23 = vpop.f32.mrf.mxu1  ;;  %3891 = vrcp.f32 %v1304_v53  ;;  %3390 = vmatprep.subr.bf16.mxu1 %v5665_v35  ;;  %v5211_v48 = vadd.f32 %v5133_v46, %v5015_v54  ;;  %v3140_v14 = vmul.f32 -1.442695, %v5194_v44  ;;  %v1885_v55 = vadd.f32 %v5148_v19, %v5018_v57  ;;  %v5669_v35 = vld [vmem:[#allocation50_spill] sm:$0xff] }
 0x1f5   : > { %v3868_v18 = vpop.eup %3867  ;;  %v3339_v51 = vpop.f32.mrf.mxu0  ;;  %3893 = vpow2.f32 %v3130_v25  ;;  %v3139_v25 = vmul.f32 -1.442695, %v5187_v6  ;;  %v5220_v46 = vadd.f32 %v1035_v11, %v4895_v34  ;;  %v1887_v34 = vadd.f32 %v5167_v52, %v5015_v54 }
 0x1f6   : > { %v3870_v39 = vpop.eup %3869  ;;  %v1438_v16 = vmul.f32 %v3868_v18, %v5664_v28  ;;  %v5199_v17 = vpop.f32.mrf.mxu1  ;;  %3895 = vrcp.f32 %v1306_v30  ;;  %v3340_v37 = vadd.f32 %v3339_v51, %v3338_v56  ;;  %v5666_v51 = vld [vmem:[#allocation28_spill] sm:$0xff]  ;;  %v5668_v28 = vld [vmem:[#allocation29_spill] sm:$0xff] }
 0x1f7   : > { %v3872_v53 = vpop.eup %3871  ;;  %v1307_v13 = vadd.f32 1.0, %v3870_v39  ;;  %v3341_v33 = vpop.f32.mrf.mxu0  ;;  %3897 = vpow2.f32 %v3131_v42  ;;  %3398 = vmatpush1.bf16.msra.mxu1 %v5666_v51  ;;  %v2041_v42 = vmul.f32 %v1875_v22, %v1436_v58  ;;  %5667 = vst [vmem:[#allocation44_spill] sm:$0xff] %v5220_v46 }
 0x1f8   : > { %v5205_v24 = vpop.eup %3873  ;;  %v1439_v4 = vmul.f32 %v3872_v53, %v4987_v32  ;;  %v5213_v47 = vpop.f32.mrf.mxu1  ;;  %v2043_v30 = vmul.f32 %v1877_v63, %v1438_v16  ;;  %3391 = vmatprep.subr.bf16.mxu1 %v5668_v28  ;;  %v3142_v16 = vmul.f32 -1.442695, %v5203_v8  ;;  %v1966_v19 = vadd.f32 %v3340_v37, %v5669_v35 }
 0x1f9   : > { %v3876_v18 = vpop.eup %3875  ;;  %3899 = vrcp.f32 %v1307_v13  ;;  %v3342_v56 = vpop.f32.mrf.mxu0 }
 0x1fa   : > { %v3878_v32 = vpop.eup %3877  ;;  %3901 = vpow2.f32 %v3133_v15  ;;  %v2044_v39 = vmul.f32 %v1879_v59, %v1439_v4  ;;  %v5222_v45 = vpop.f32.mrf.mxu1  ;;  %v3343_v53 = vadd.f32 %v3342_v56, %v3341_v33  ;;  %v5670_v15 = vld [vmem:[#allocation48_spill] sm:$0xff]  ;;  %v2082_v4 = vpack.c.bf16 %v2043_v30, %v2040_v7  ;;  %v5671_v56 = vld [vmem:[#allocation30_spill] sm:$0xff] }
 0x1fb   : > { %v3880_v63 = vpop.eup %3879  ;;  %3903 = vpow2.f32 %v3134_v2  ;;  %v3344_v13 = vpop.f32.mrf.mxu0  ;;  %v1442_v22 = vmul.f32 %v3878_v32, %v5670_v15  ;;  %v1889_v2 = vadd.f32 %v5176_v0, %v5018_v57  ;;  %3399 = vmatpush1.bf16.msra.mxu1 %v5671_v56  ;;  %v5672_v32 = vld [vmem:[#allocation46_spill] sm:$0xff]  ;;  %v2030_v30 = vmul.f32 %v1966_v19, %v5024_v9 }
 0x1fc   : > { %v5227_v51 = vpop.eup %3881  ;;  %3905 = vpow2.f32 %v3136_v29  ;;  %v2083_v11 = vpack.c.bf16 %v2044_v39, %v2041_v42  ;;  %v5232_v59 = vpop.f32.mrf.mxu1  ;;  %v1969_v33 = vadd.f32 %v3343_v53, %v5669_v35  ;;  %v1441_v29 = vmul.f32 %v3876_v18, %v5672_v32  ;;  %v5674_v53 = vld [vmem:[#allocation51_spill] sm:$0xff] }
 0x1fd   : > { %v3884_v58 = vpop.eup %3883  ;;  %3907 = vpow2.f32 %v3137_v38  ;;  %v3345_v37 = vpop.f32.mrf.mxu0  ;;  %v1309_v52 = vadd.f32 1.0, %v3880_v63  ;;  %v3143_v42 = vmul.f32 -1.442695, %v5220_v46  ;;  %v5673_v38 = vld [vmem:[#allocation31_spill] sm:$0xff]  ;;  %v1893_v9 = vadd.f32 %v5189_v23, %v5015_v54 }
 0x1fe   : > { %v3886_v28 = vpop.eup %3885  ;;  %v1444_v15 = vmul.f32 %v3884_v58, %v5009_v5  ;;  %2472 = vmatprep.mubr.bf16.mxu1 %v2083_v11  ;;  %v5241_v39 = vpop.f32.mrf.mxu1  ;;  %3392 = vmatprep.subr.bf16.mxu1 %v5673_v38  ;;  %3909 = vpow2.f32 %v3139_v25  ;;  %v2033_v56 = vmul.f32 %v1969_v33, %v5674_v53  ;;  %v2047_v5 = vmul.f32 %v1885_v55, %v1442_v22 }
 0x1ff   : > { %v3888_v0 = vpop.eup %3887  ;;  %v1445_v7 = vmul.f32 %v3886_v28, %v5012_v27  ;;  %2473 = vmatmul.mubr.bf16.gmra.mxu1 %v2082_v4  ;;  %v3347_v18 = vpop.f32.mrf.mxu0  ;;  %3911 = vpow2.f32 %v3140_v14  ;;  %v3346_v63 = vadd.f32 %v3345_v37, %v3344_v13  ;;  %v5675_v27 = vld [vmem:[#allocation32_spill] sm:$0xff]  ;;  %v1895_v14 = vadd.f32 %v5199_v17, %v5018_v57 }
 0x200   : > { %v1310_v32 = vadd.f32 1.0, %v3888_v0  ;;  %v5247_v58 = vpop.f32.mrf.mxu1  ;;  %v3890_v11 = vpop.eup %3889  ;;  %3913 = vpow2.f32 %v3142_v16  ;;  %v2049_v50 = vmul.f32 %v1887_v34, %v1444_v15  ;;  %v2078_v3 = vpack.c.bf16 %v2033_v56, %v2030_v30  ;;  %3400 = vmatpush1.bf16.msra.mxu1 %v5675_v27  ;;  %v5676_v16 = vld [vmem:[#allocation34_spill] sm:$0xff]  ;;  %v3955_v56 = vld [vmem:[%s4540_s21 + $0x100] ss:$8 sps:$4 sm:$0xff]  }
 0x201   : > { %v2050_v38 = vmul.f32 %v1889_v2, %v1445_v7  ;;  %v3348_v46 = vpop.f32.mrf.mxu0  ;;  %v3892_v25 = vpop.eup %3891  ;;  %3915 = vrcp.f32 %v1309_v52  ;;  %v1897_v55 = vadd.f32 %v5213_v47, %v5015_v54  ;;  %3393 = vmatprep.subr.bf16.mxu1 %v5676_v16  ;;  %v1447_v22 = vmul.f32 %v3890_v11, %v5037_v60  ;;  %v5678_v52 = vld [vmem:[#allocation54_spill] sm:$0xff] }
 0x202   : > { %v5256_v19 = vpop.f32.mrf.mxu1  ;;  %v3894_v13 = vpop.eup %3893  ;;  %v2046_v34 = vmul.f32 %v5211_v48, %v1441_v29  ;;  %3917 = vpow2.f32 %v3143_v42  ;;  %2566 = vmatmul.mubr.bf16.vlgmr.msra.gmra.mxu0 %v2078_v3  ;;  %v1974_v17 = vadd.f32 %v3346_v63, %v5669_v35  ;;  %v3349_v37 = vadd.f32 %v3348_v46, %v3347_v18 }
 0x203   : > { %v2086_v2 = vpack.c.bf16 %v2050_v38, %v2047_v5  ;;  %v3350_v4 = vpop.f32.mrf.mxu0  ;;  %v3896_v23 = vpop.eup %3895  ;;  %3919 = vrcp.f32 %v1310_v32  ;;  %v1312_v33 = vadd.f32 1.0, %v3894_v13  ;;  %v5677_v28 = vmov 0   ;;  %v5679_v32 = vld [vmem:[#allocation56_spill] sm:$0xff]  ;;  %v5680_v38 = vld [vmem:[#allocation58_spill] sm:$0xff] }
 0x204   : > { %v5262_v47 = vpop.f32.mrf.mxu1  ;;  %2575 = vmatprep.mubr.bf16.mxu0 %v5677_v28  ;;  %v3898_v15 = vpop.eup %3897  ;;  %v1448_v60 = vmul.f32 %v3892_v25, %v5678_v52  ;;  %v1450_v48 = vmul.f32 %v3896_v23, %v5057_v12  ;;  %v1899_v3 = vadd.f32 %v5222_v45, %v5018_v57  ;;  %v2085_v29 = vpack.c.bf16 %v2049_v50, %v2046_v34 }
 0x205   : > { %2482 = vmatprep.mubr.bf16.mxu1 %v2086_v2  ;;  %v3351_v42 = vpop.f32.mrf.mxu0  ;;  %3921 = vrcp.f32 %v1312_v33  ;;  %v1313_v7 = vadd.f32 1.0, %v3898_v15  ;;  %v1977_v46 = vadd.f32 %v3349_v37, %v5669_v35  ;;  %3401 = vmatpush1.bf16.msra.mxu1 %v3955_v56  ;;  %v3144_v12 = vmul.f32 -1.442695, %v5162_v41 }
 0x206   : > { %v3900_v0 = vpop.eup %3899  ;;  %v3352_v30 = vadd.f32 %v3351_v42, %v3350_v4  ;;  %v5270_v53 = vpop.f32.mrf.mxu1  ;;  %3923 = vpow2.f32 %v5159_v36  ;;  %v2052_v45 = vmul.f32 %v1893_v9, %v1447_v22  ;;  %v2036_v27 = vmul.f32 %v1974_v17, %v5680_v38 }
 0x207   : > { %v3902_v18 = vpop.eup %3901  ;;  %v1451_v5 = vmul.f32 %v3900_v0, %v5679_v32  ;;  %2483 = vmatmul.mubr.bf16.gmra.mxu1 %v2085_v29  ;;  %v3353_v50 = vpop.f32.mrf.mxu0  ;;  %3925 = vrcp.f32 %v1313_v7  ;;  %v2039_v25 = vmul.f32 %v1977_v46, %v5113_v40  ;;  %v2053_v2 = vmul.f32 %v1895_v14, %v1448_v60  ;;  %v5681_v0 = vld [vmem:[#allocation37_spill] sm:$0xff] }
 0x208   : > { %v3904_v63 = vpop.eup %3903  ;;  %v1315_v11 = vadd.f32 1.0, %v3902_v18  ;;  %v5278_v16 = vpop.f32.mrf.mxu1  ;;  %v2055_v36 = vmul.f32 %v1897_v55, %v1450_v48  ;;  %v1982_v22 = vadd.f32 %v3352_v30, %v5669_v35  ;;  %v5682_v7 = vld [vmem:[#allocation49_spill] sm:$0xff]  ;;  %v5683_v48 = vld [vmem:[#allocation36_spill] sm:$0xff] }
 0x209   : > { %v3906_v13 = vpop.eup %3905  ;;  %v1316_v34 = vadd.f32 1.0, %v3904_v63  ;;  %v2056_v4 = vmul.f32 %v1899_v3, %v1451_v5  ;;  %v3354_v23 = vpop.f32.mrf.mxu0  ;;  %v2081_v40 = vpack.c.bf16 %v2039_v25, %v2036_v27  ;;  %v1440_v14 = vmul.f32 %v5682_v7, %v5681_v0  ;;  %v5684_v3 = vld [vmem:[#allocation47_spill] sm:$0xff] }
 0x20a   : > { %v3908_v33 = vpop.eup %3907  ;;  %3927 = vrcp.f32 %v1315_v11  ;;  %v1318_v9 = vadd.f32 1.0, %v3906_v13  ;;  %v3355_v37 = vadd.f32 %v3354_v23, %v3353_v50  ;;  %v5281_v15 = vpop.f32.mrf.mxu1  ;;  %v1437_v46 = vmul.f32 %v5684_v3, %v5683_v48  ;;  %v5685_v50 = vld [vmem:[#allocation55_spill] sm:$0xff]  ;;  %v5687_v23 = vld [vmem:[#allocation53_spill] sm:$0xff] }
 0x20b   : > { %3929 = vrcp.f32 %v1316_v34  ;;  %v1319_v17 = vadd.f32 1.0, %v3908_v33  ;;  %v2089_v52 = vpack.c.bf16 %v2056_v4, %v2053_v2  ;;  %v3356_v29 = vpop.f32.mrf.mxu0  ;;  %v3910_v42 = vpop.eup %3909  ;;  %v2088_v56 = vpack.c.bf16 %v2055_v36, %v2052_v45  ;;  %2576 = vmatmul.mubr.bf16.gmra.mxu0 %v2081_v40  ;;  %v5686_v4 = vld [vmem:[#allocation38_spill] sm:$0xff]  ;;  %v5689_v40 = vld [vmem:[#allocation57_spill] sm:$0xff] }
 0x20c   : > { %3931 = vrcp.f32 %v1318_v9  ;;  %v1985_v55 = vadd.f32 %v3355_v37, %v5669_v35  ;;  %v3912_v60 = vpop.eup %3911  ;;  %v1321_v30 = vadd.f32 1.0, %v3910_v42  ;;  %v5288_v18 = vpop.f32.mrf.mxu1  ;;  %v1314_v63 = vadd.f32 1.0, %v5685_v50  ;;  %2585 = vmatprep.mubr.bf16.mxu0 %v5677_v28 }
 0x20d   : > { %3933 = vrcp.f32 %v1319_v17  ;;  %2492 = vmatprep.mubr.bf16.mxu1 %v2089_v52  ;;  %v3357_v32 = vpop.f32.mrf.mxu0  ;;  %v3914_v5 = vpop.eup %3913  ;;  %v1322_v11 = vadd.f32 1.0, %v3912_v60  ;;  %v2042_v13 = vmul.f32 %v1982_v22, %v1437_v46  ;;  %v1443_v33 = vmul.f32 %v5687_v23, %v5686_v4  ;;  %v5688_v52 = vld [vmem:[#allocation39_spill] sm:$0xff] }
 0x20e   : > { %3935 = vpow2.f32 %v3144_v12  ;;  %v2045_v38 = vmul.f32 %v1985_v55, %v1440_v14  ;;  %v3916_v27 = vpop.eup %3915  ;;  %v1324_v25 = vadd.f32 1.0, %v3914_v5  ;;  %v3358_v34 = vadd.f32 %v3357_v32, %v3356_v29  ;;  %v1924_v12 = vpop.f32.mrf.mxu1  ;;  %v5690_v32 = vld [vmem:[#allocation40_spill] sm:$0xff]  ;;  %v5691_v5 = vld [vmem:[#allocation41_spill] sm:$0xff] }
 0x20f   : > { %3937 = vrcp.f32 %v1321_v30  ;;  %2493 = vmatmul.mubr.bf16.gmra.mxu1 %v2088_v56  ;;  %v3359_v2 = vpop.f32.mrf.mxu0  ;;  %v3918_v45 = vpop.eup %3917  ;;  %v1446_v42 = vmul.f32 %v5689_v40, %v5688_v52  ;;  %v1320_v0 = vadd.f32 1.0, %v5227_v51  ;;  %v1905_v7 = vadd.f32 %v5241_v39, %v5018_v57 }
 0x210   : > { %3939 = vrcp.f32 %v1322_v11  ;;  %v3920_v36 = vpop.eup %3919  ;;  %v1325_v9 = vadd.f32 1.0, %v3918_v45  ;;  %v2084_v17 = vpack.c.bf16 %v2045_v38, %v2042_v13  ;;  %v1907_v14 = vadd.f32 %v5247_v58, %v5015_v54 }
 0x211   : > { %3941 = vrcp.f32 %v1324_v25  ;;  %v3360_v37 = vpop.f32.mrf.mxu0  ;;  %v1990_v55 = vadd.f32 %v3358_v34, %v5669_v35  ;;  %v1454_v3 = vmul.f32 %v3920_v36, %v5118_v10  ;;  %v1909_v51 = vadd.f32 %v5256_v19, %v5018_v57 }
 0x212   : > { %3943 = vrcp.f32 %v1314_v63  ;;  %v3361_v22 = vadd.f32 %v3360_v37, %v3359_v2  ;;  %v3922_v29 = vpop.eup %3921  ;;  %v1449_v39 = vmul.f32 %v5093_v26, %v5690_v32  ;;  %v5313_v58 = vmul.f32 %v5105_v62, %v5691_v5  ;;  %v1926_v63 = vpop.f32.mrf.mxu1 }
 0x213   : > { %3945 = vrcp.f32 %v1325_v9  ;;  %v3362_v60 = vpop.f32.mrf.mxu0  ;;  %v5302_v48 = vpop.eup %3923  ;;  %v1456_v46 = vmul.f32 %v3922_v29, %v5137_v43  ;;  %v1453_v50 = vmul.f32 %v3916_v27, %v5083_v31  ;;  %v1903_v10 = vadd.f32 %v5232_v59, %v5015_v54  ;;  %2586 = vmatmul.mubr.bf16.gmra.mxu0 %v2084_v17 }
 0x214   : > { %v1993_v30 = vadd.f32 %v3361_v22, %v5669_v35  ;;  %v3926_v56 = vpop.eup %3925  ;;  %v1317_v19 = vadd.f32 1.0, %v5205_v24  ;;  %2595 = vmatprep.mubr.bf16.mxu0 %v5677_v28  ;;  %3947 = vrcp.f32 %v1320_v0  ;;  %v1913_v31 = vadd.f32 %v5262_v47, %v5015_v54  ;;  %v1928_v9 = vpop.f32.mrf.mxu1 }
 0x215   : > { %v3363_v43 = vpop.f32.mrf.mxu0  ;;  %v1457_v11 = vmul.f32 %v3926_v56, %v5141_v1  ;;  %v2061_v62 = vmul.f32 %v1907_v14, %v1456_v46  ;;  %v2048_v27 = vmul.f32 %v1990_v55, %v1443_v33  ;;  %v2059_v34 = vmul.f32 %v1905_v7, %v1454_v3 }
 0x216   : > { %v2051_v38 = vmul.f32 %v1993_v30, %v1446_v42  ;;  %v3364_v25 = vadd.f32 %v3363_v43, %v3362_v60  ;;  %v1915_v24 = vadd.f32 %v5270_v53, %v5018_v57  ;;  %v1917_v1 = vadd.f32 %v5278_v16, %v5015_v54 }
 0x217   : > { %v3928_v26 = vpop.eup %3927  ;;  %v3365_v13 = vpop.f32.mrf.mxu0  ;;  %v2062_v2 = vmul.f32 %v1909_v51, %v1457_v11  ;;  %v2058_v4 = vmul.f32 %v1903_v10, %v1453_v50  ;;  %v1919_v23 = vadd.f32 %v5281_v15, %v5018_v57  ;;  %v1923_v53 = vadd.f32 %v5288_v18, %v5015_v54  ;;  %v5692_v11 = vld [vmem:[#allocation44_spill] sm:$0xff] }
 0x218   : > { %v3930_v59 = vpop.eup %3929  ;;  %v2087_v33 = vpack.c.bf16 %v2051_v38, %v2048_v27  ;;  %v1998_v40 = vadd.f32 %v3364_v25, %v5669_v35  ;;  %v1925_v0 = vadd.f32 %v1924_v12, %v5018_v57  ;;  %v1459_v7 = vmul.f32 %v3928_v26, %v5144_v49 }
 0x219   : > { %v3932_v45 = vpop.eup %3931  ;;  %v1460_v36 = vmul.f32 %v3930_v59, %v5153_v61  ;;  %v3366_v47 = vpop.f32.mrf.mxu0  ;;  %v2092_v52 = vpack.c.bf16 %v2062_v2, %v2059_v34  ;;  %v2091_v61 = vpack.c.bf16 %v2061_v62, %v2058_v4  ;;  %v1929_v55 = vadd.f32 %v1928_v9, %v5018_v57  ;;  %v5693_v2 = vld [vmem:[#allocation43_spill] sm:$0xff] }
 0x21a   : > { %v3934_v37 = vpop.eup %3933  ;;  %v1462_v17 = vmul.f32 %v3932_v45, %v5156_v20  ;;  %v3367_v22 = vadd.f32 %v3366_v47, %v3365_v13  ;;  %v1927_v20 = vadd.f32 %v1926_v63, %v5015_v54  ;;  %3949 = vrcp.f32 %v1317_v19  ;;  %v5695_v45 = vld [vmem:[#allocation60_spill] sm:$0xff] }
 0x21b   : > { %v3936_v16 = vpop.eup %3935  ;;  %v1463_v42 = vmul.f32 %v3934_v37, %v5165_v21  ;;  %v3368_v15 = vpop.f32.mrf.mxu0  ;;  %v2065_v14 = vmul.f32 %v1915_v24, %v1460_v36  ;;  %2502 = vmatprep.mubr.bf16.mxu1 %v2092_v52  ;;  %2596 = vmatmul.mubr.bf16.gmra.mxu0 %v2087_v33  ;;  %v2054_v30 = vmul.f32 %v1998_v40, %v1449_v39  ;;  %v1323_v63 = vadd.f32 1.0, %v5302_v48 }
 0x21c   : > { %v3938_v29 = vpop.eup %3937  ;;  %2503 = vmatmul.mubr.bf16.gmra.mxu1 %v2091_v61  ;;  %v2001_v21 = vadd.f32 %v3367_v22, %v5669_v35  ;;  %v2067_v49 = vmul.f32 %v1917_v1, %v1462_v17  ;;  %2605 = vmatprep.mubr.bf16.mxu0 %v5677_v28  ;;  %v1326_v43 = vadd.f32 1.0, %v3936_v16  ;;  %v2064_v38 = vmul.f32 %v1913_v31, %v1459_v7  ;;  %v5694_v1 = vld [vmem:[#allocation42_spill] sm:$0xff]  ;;  %v5697_v22 = vld [vmem:[#allocation52_spill] sm:$0xff] }
 0x21d   : > { %v3940_v18 = vpop.eup %3939  ;;  %v1465_v60 = vmul.f32 %v3938_v29, %v5187_v6  ;;  %v2068_v3 = vmul.f32 %v1919_v23, %v1463_v42  ;;  %v3369_v12 = vpop.f32.mrf.mxu0  ;;  %v1455_v31 = vmul.f32 %v5695_v45, %v5694_v1  ;;  %v5696_v42 = vld [vmem:[#allocation59_spill] sm:$0xff] }
 0x21e   : > { %v3942_v46 = vpop.eup %3941  ;;  %v1466_v51 = vmul.f32 %v3940_v18, %v5194_v44  ;;  %v3370_v56 = vadd.f32 %v3369_v12, %v3368_v15  ;;  %v2057_v6 = vmul.f32 %v2001_v21, %v5313_v58  ;;  %3951 = vrcp.f32 %v1326_v43 }
 0x21f   : > { %v3944_v54 = vpop.eup %3943  ;;  %v1468_v57 = vmul.f32 %v3942_v46, %v5203_v8  ;;  %v2070_v32 = vmul.f32 %v1923_v53, %v1465_v60  ;;  %v2095_v5 = vpack.c.bf16 %v2068_v3, %v2065_v14  ;;  %v3371_v50 = vpop.f32.mrf.mxu0  ;;  %v2094_v8 = vpack.c.bf16 %v2067_v49, %v2064_v38  ;;  %v2100_v38 = vld [vmem:[#allocation2 + $0xb0] sm:$0xff] }
 0x220   : > { %v3946_v10 = vpop.eup %3945  ;;  %v2071_v19 = vmul.f32 %v1925_v0, %v1466_v51  ;;  %v2090_v26 = vpack.c.bf16 %v2057_v6, %v2054_v30  ;;  %v2006_v59 = vadd.f32 %v3370_v56, %v5669_v35  ;;  %v1458_v24 = vmul.f32 %v3944_v54, %v5693_v2  ;;  %v5698_v30 = vld [vmem:[#allocation61_spill] sm:$0xff] }
 0x221   : > { %v1469_v44 = vmul.f32 %v3946_v10, %v5692_v11  ;;  %v2073_v39 = vmul.f32 %v1927_v20, %v1468_v57  ;;  %2512 = vmatprep.mubr.bf16.mxu1 %v2095_v5  ;;  %v3372_v25 = vpop.f32.mrf.mxu0  ;;  %v3948_v34 = vpop.eup %3947  ;;  %3953 = vrcp.f32 %v1323_v63 }
 0x222   : > { %v3373_v62 = vadd.f32 %v3372_v25, %v3371_v50  ;;  %v2060_v9 = vmul.f32 %v2006_v59, %v1455_v31  ;;  %v1464_v61 = vmul.f32 %v3948_v34, %v5696_v42  ;;  %v2102_v59 = vld [vmem:[#allocation2 + $0xd8] sm:$0xff]  ;;  %v2106_v42 = vld [vmem:[#allocation2 + $0x30] sm:$0xff] }
 0x223   : > { %v2074_v27 = vmul.f32 %v1929_v55, %v1469_v44  ;;  %v2097_v13 = vpack.c.bf16 %v2073_v39, %v2070_v32  ;;  %v3374_v58 = vpop.f32.mrf.mxu0  ;;  %2606 = vmatmul.mubr.bf16.gmra.mxu0 %v2090_v26 }
 0x224   : > { %v2009_v48 = vadd.f32 %v3373_v62, %v5669_v35  ;;  %2513 = vmatmul.mubr.bf16.gmra.mxu1 %v2094_v8  ;;  %2615 = vmatprep.mubr.bf16.mxu0 %v5677_v28  ;;  %v2101_v62 = vld [vmem:[#allocation2] sm:$0xff] }
 0x225   : > { %v2098_v36 = vpack.c.bf16 %v2074_v27, %v2071_v19  ;;  %v3375_v4 = vpop.f32.mrf.mxu0 }
 0x226   : > { %v2063_v23 = vmul.f32 %v2009_v48, %v1458_v24  ;;  %v3376_v47 = vadd.f32 %v3375_v4, %v3374_v58  ;;  %v2103_v48 = vld [vmem:[#allocation2 + $0x18] sm:$0xff] }
 0x227   : > { %2522 = vmatprep.mubr.bf16.mxu1 %v2098_v36  ;;  %v3377_v33 = vpop.f32.mrf.mxu0  ;;  %v3950_v52 = vpop.eup %3949 }
 0x228   : > { %v2093_v17 = vpack.c.bf16 %v2063_v23, %v2060_v9  ;;  %v2014_v40 = vadd.f32 %v3376_v47, %v5669_v35  ;;  %v1461_v15 = vmul.f32 %v3950_v52, %v5697_v22  ;;  %v2104_v9 = vld [vmem:[#allocation2 + $0x50] sm:$0xff] }
 0x229   : > { %v3378_v37 = vpop.f32.mrf.mxu0 }
 0x22a   : > { %v3379_v53 = vadd.f32 %v3378_v37, %v3377_v33  ;;  %v2066_v14 = vmul.f32 %v2014_v40, %v1461_v15  ;;  %v2107_v15 = vld [vmem:[#allocation2 + $0x48] sm:$0xff] }
 0x22b   : > { %v3380_v16 = vpop.f32.mrf.mxu0  ;;  %2616 = vmatmul.mubr.bf16.gmra.mxu0 %v2093_v17  ;;  %v3952_v18 = vpop.eup %3951  ;;  %v2105_v17 = vld [vmem:[#allocation2 + $0x68] sm:$0xff] }
 0x22c   : > { %v2017_v0 = vadd.f32 %v3379_v53, %v5669_v35  ;;  %2523 = vmatmul.mubr.bf16.gmra.mxu1 %v2097_v13  ;;  %v1470_v51 = vmul.f32 %v3952_v18, %v5162_v41 }
 0x22d   : > { %v3381_v29 = vpop.f32.mrf.mxu0  ;;  %2625 = vmatprep.mubr.bf16.mxu1 %v5677_v28 }
 0x22e   : > { %v2069_v7 = vmul.f32 %v2017_v0, %v1464_v61  ;;  %v3382_v20 = vadd.f32 %v3381_v29, %v3380_v16  ;;  %v3954_v21 = vpop.eup %3953 }
 0x22f   : > { %v3383_v55 = vpop.f32.mrf.mxu0  ;;  %v1467_v56 = vmul.f32 %v3954_v21, %v5698_v30  ;;  %v2109_v21 = vld [vmem:[#allocation2 + $0x88] sm:$0xff] }
 0x230   : > { %v2096_v60 = vpack.c.bf16 %v2069_v7, %v2066_v14  ;;  %v2022_v46 = vadd.f32 %v3382_v20, %v5669_v35  ;;  %v2110_v30 = vld [vmem:[#allocation2 + $0xe8] sm:$0xff] }
 0x231   : > { %v3384_v3 = vpop.f32.mrf.mxu0 }
 0x232   : > { %v3385_v12 = vadd.f32 %v3384_v3, %v3383_v55  ;;  %v2072_v57 = vmul.f32 %v2022_v46, %v1467_v56  ;;  %v2108_v55 = vld [vmem:[#allocation2 + $0x80] sm:$0xff] }
 0x234   : > { %v2025_v49 = vadd.f32 %v3385_v12, %v5669_v35  ;;  %2626 = vmatmul.mubr.bf16.vlgmr.msra.gmra.mxu1 %v2096_v60 }
 0x235   : > { %2635 = vmatprep.mubr.bf16.mxu1 %v5677_v28 }
 0x236   : > { %v2075_v54 = vmul.f32 %v2025_v49, %v1470_v51 }
 0x238   : > { %v2099_v32 = vpack.c.bf16 %v2075_v54, %v2072_v57 }
 0x23c   : > { %2636 = vmatmul.mubr.bf16.gmra.mxu1 %v2099_v32  ;;  %v2111_v32 = vld [vmem:[#allocation2 + $0xb8] sm:$0xff] }
 0x2a5   : > { %v2454_v5 = vpop.f32.mrf.mxu1 }
 0x2a7   : > { %v2456_v6 = vpop.f32.mrf.mxu1 }
 0x2a9   : > { %v2458_v50 = vpop.f32.mrf.mxu1 }
 0x2ab   : > { %v2460_v10 = vpop.f32.mrf.mxu1 }
 0x2ad   : > { %v2464_v63 = vpop.f32.mrf.mxu1 }
 0x2af   : > { %v2466_v43 = vpop.f32.mrf.mxu1 }
 0x2b1   : > { %v2468_v19 = vpop.f32.mrf.mxu1 }
 0x2b3   : > { %v2470_v11 = vpop.f32.mrf.mxu1 }
 0x2bf   : > { %v2474_v41 = vpop.f32.mrf.mxu1 }
 0x2c1   : > { %v2476_v44 = vpop.f32.mrf.mxu1 }
 0x2c2   : > { %v2567_v39 = vpop.f32.mrf.mxu0 }
 0x2c3   : > { %v2478_v35 = vpop.f32.mrf.mxu1  ;;  %v2568_v25 = vadd.f32 %v2567_v39, %v2454_v5 }
 0x2c4   : > { %v2569_v28 = vpop.f32.mrf.mxu0 }
 0x2c5   : > { %v2480_v26 = vpop.f32.mrf.mxu1  ;;  %v2646_v27 = vadd.f32 %v2568_v25, %v2100_v38  ;;  %v2570_v8 = vadd.f32 %v2569_v28, %v2456_v6 }
 0x2c6   : > { %v2571_v58 = vpop.f32.mrf.mxu0 }
 0x2c7   : > { %v5363_v13 = vpop.f32.mrf.mxu1  ;;  %2678 = vst [vmem:[#allocation2 + $0xb0] sm:$0xff] %v2646_v27  ;;  %v2647_v34 = vadd.f32 %v2570_v8, %v2101_v62  ;;  %v2572_v2 = vadd.f32 %v2571_v58, %v2458_v50  ;;  %v2114_v62 = vld [vmem:[#allocation2 + $0x8] sm:$0xff] }
 0x2c8   : > { %v2573_v1 = vpop.f32.mrf.mxu0 }
 0x2c9   : > { %v5365_v24 = vpop.f32.mrf.mxu1  ;;  %2679 = vst [vmem:[#allocation2] sm:$0xff] %v2647_v34  ;;  %v2648_v45 = vadd.f32 %v2572_v2, %v2102_v59  ;;  %v2574_v31 = vadd.f32 %v2573_v1, %v2460_v10  ;;  %v2115_v59 = vld [vmem:[#allocation2 + $0x78] sm:$0xff] }
 0x2cb   : > { %v5367_v36 = vpop.f32.mrf.mxu1  ;;  %2680 = vst [vmem:[#allocation2 + $0xd8] sm:$0xff] %v2648_v45  ;;  %v2649_v4 = vadd.f32 %v2574_v31, %v2103_v48  ;;  %v2577_v47 = vpop.f32.mrf.mxu0  ;;  %v2116_v48 = vld [vmem:[#allocation2 + $0x38] sm:$0xff] }
 0x2cc   : > { %v2578_v33 = vadd.f32 %v2577_v47, %v2464_v63  ;;  %v2112_v63 = vld [vmem:[#allocation2 + $0x60] sm:$0xff] }
 0x2cd   : > { %v5369_v23 = vpop.f32.mrf.mxu1  ;;  %2681 = vst [vmem:[#allocation2 + $0x18] sm:$0xff] %v2649_v4  ;;  %v2579_v52 = vpop.f32.mrf.mxu0  ;;  %v2117_v4 = vld [vmem:[#allocation2 + $0x58] sm:$0xff] }
 0x2ce   : > { %v2650_v53 = vadd.f32 %v2578_v33, %v2104_v9  ;;  %v2580_v40 = vadd.f32 %v2579_v52, %v2466_v43 }
 0x2cf   : > { %v5371_v37 = vpop.f32.mrf.mxu1  ;;  %v2581_v61 = vpop.f32.mrf.mxu0 }
 0x2d0   : > { %2682 = vst [vmem:[#allocation2 + $0x50] sm:$0xff] %v2650_v53  ;;  %v2651_v0 = vadd.f32 %v2580_v40, %v2105_v17  ;;  %v2582_v22 = vadd.f32 %v2581_v61, %v2468_v19  ;;  %v2118_v17 = vld [vmem:[#allocation2 + $0x40] sm:$0xff] }
 0x2d1   : > { %v5373_v16 = vpop.f32.mrf.mxu1  ;;  %v2583_v29 = vpop.f32.mrf.mxu0 }
 0x2d2   : > { %2683 = vst [vmem:[#allocation2 + $0x68] sm:$0xff] %v2651_v0  ;;  %v2652_v7 = vadd.f32 %v2582_v22, %v2106_v42  ;;  %v2584_v14 = vadd.f32 %v2583_v29, %v2470_v11  ;;  %v2119_v42 = vld [vmem:[#allocation2 + $0xc8] sm:$0xff] }
 0x2d3   : > { %v5375_v20 = vpop.f32.mrf.mxu1  ;;  %v2587_v18 = vpop.f32.mrf.mxu0 }
 0x2d4   : > { %2684 = vst [vmem:[#allocation2 + $0x30] sm:$0xff] %v2652_v7  ;;  %v2653_v60 = vadd.f32 %v2584_v14, %v2107_v15  ;;  %v2588_v3 = vadd.f32 %v2587_v18, %v2474_v41  ;;  %v2120_v15 = vld [vmem:[#allocation2 + $0xe0] sm:$0xff] }
 0x2d5   : > { %v2589_v12 = vpop.f32.mrf.mxu0  ;;  %v2500_v49 = vpop.f32.mrf.mxu1 }
 0x2d6   : > { %2685 = vst [vmem:[#allocation2 + $0x48] sm:$0xff] %v2653_v60  ;;  %v2654_v46 = vadd.f32 %v2588_v3, %v2108_v55  ;;  %v2590_v51 = vadd.f32 %v2589_v12, %v2476_v44  ;;  %v2113_v44 = vld [vmem:[#allocation2 + $0xf0] sm:$0xff] }
 0x2d7   : > { %v2591_v56 = vpop.f32.mrf.mxu0  ;;  %v2121_v55 = vld [vmem:[#allocation2 + $0x90] sm:$0xff] }
 0x2d8   : > { %2686 = vst [vmem:[#allocation2 + $0x80] sm:$0xff] %v2654_v46  ;;  %v2655_v54 = vadd.f32 %v2590_v51, %v2109_v21  ;;  %v2592_v57 = vadd.f32 %v2591_v56, %v2478_v35 }
 0x2d9   : > { %v2593_v5 = vpop.f32.mrf.mxu0 }
 0x2da   : > { %2687 = vst [vmem:[#allocation2 + $0x88] sm:$0xff] %v2655_v54  ;;  %v2656_v6 = vadd.f32 %v2592_v57, %v2110_v30  ;;  %v2594_v50 = vadd.f32 %v2593_v5, %v2480_v26 }
 0x2db   : > { %v2597_v43 = vpop.f32.mrf.mxu0 }
 0x2dc   : > { %v2504_v10 = vpop.f32.mrf.mxu1  ;;  %2688 = vst [vmem:[#allocation2 + $0xe8] sm:$0xff] %v2656_v6  ;;  %v2657_v19 = vadd.f32 %v2594_v50, %v2111_v32  ;;  %v2598_v11 = vadd.f32 %v2597_v43, %v5363_v13  ;;  %v2124_v32 = vld [vmem:[#allocation2 + $0xa8] sm:$0xff] }
 0x2dd   : > { %v2599_v38 = vpop.f32.mrf.mxu0 }
 0x2de   : > { %v2506_v41 = vpop.f32.mrf.mxu1  ;;  %2689 = vst [vmem:[#allocation2 + $0xb8] sm:$0xff] %v2657_v19  ;;  %v2658_v39 = vadd.f32 %v2598_v11, %v2112_v63  ;;  %v2600_v25 = vadd.f32 %v2599_v38, %v5365_v24  ;;  %v2126_v11 = vld [vmem:[#allocation2 + $0x10] sm:$0xff] }
 0x2df   : > { %v2601_v28 = vpop.f32.mrf.mxu0 }
 0x2e0   : > { %v2508_v35 = vpop.f32.mrf.mxu1  ;;  %2690 = vst [vmem:[#allocation2 + $0x60] sm:$0xff] %v2658_v39  ;;  %v2659_v27 = vadd.f32 %v2600_v25, %v2113_v44  ;;  %v2602_v26 = vadd.f32 %v2601_v28, %v5367_v36  ;;  %v2127_v39 = vld [vmem:[#allocation2 + $0x28] sm:$0xff]  ;;  %v2128_v28 = vld [vmem:[#allocation2 + $0xa0] sm:$0xff] }
 0x2e1   : > { %v2603_v58 = vpop.f32.mrf.mxu0 }
 0x2e2   : > { %v2510_v8 = vpop.f32.mrf.mxu1  ;;  %2691 = vst [vmem:[#allocation2 + $0xf0] sm:$0xff] %v2659_v27  ;;  %v2660_v34 = vadd.f32 %v2602_v26, %v2114_v62  ;;  %v2604_v13 = vadd.f32 %v2603_v58, %v5369_v23 }
 0x2e3   : > { %v2607_v1 = vpop.f32.mrf.mxu0 }
 0x2e4   : > { %v2514_v2 = vpop.f32.mrf.mxu1  ;;  %2692 = vst [vmem:[#allocation2 + $0x8] sm:$0xff] %v2660_v34  ;;  %v2661_v45 = vadd.f32 %v2604_v13, %v2115_v59  ;;  %v2608_v24 = vadd.f32 %v2607_v1, %v5371_v37  ;;  %v2129_v59 = vld [vmem:[#allocation2 + $0xf8] sm:$0xff] }
 0x2e5   : > { %v2609_v9 = vpop.f32.mrf.mxu0 }
 0x2e6   : > { %v2516_v31 = vpop.f32.mrf.mxu1  ;;  %2693 = vst [vmem:[#allocation2 + $0x78] sm:$0xff] %v2661_v45  ;;  %v2662_v47 = vadd.f32 %v2608_v24, %v2116_v48  ;;  %v2610_v36 = vadd.f32 %v2609_v9, %v5373_v16  ;;  %v2131_v24 = vld [vmem:[#allocation2 + $0x98] sm:$0xff] }
 0x2e7   : > { %v2611_v52 = vpop.f32.mrf.mxu0 }
 0x2e8   : > { %v2518_v33 = vpop.f32.mrf.mxu1  ;;  %2694 = vst [vmem:[#allocation2 + $0x38] sm:$0xff] %v2662_v47  ;;  %v2663_v53 = vadd.f32 %v2610_v36, %v2117_v4  ;;  %v2612_v23 = vadd.f32 %v2611_v52, %v5375_v20  ;;  %v2122_v20 = vld [vmem:[#allocation2 + $0x70] sm:$0xff] }
 0x2e9   : > { %v2613_v61 = vpop.f32.mrf.mxu0 }
 0x2ea   : > { %v2520_v40 = vpop.f32.mrf.mxu1  ;;  %2695 = vst [vmem:[#allocation2 + $0x58] sm:$0xff] %v2663_v53  ;;  %v2664_v0 = vadd.f32 %v2612_v23, %v2118_v17  ;;  %v2614_v37 = vadd.f32 %v2613_v61, %v2500_v49  ;;  %v2123_v49 = vld [vmem:[#allocation2 + $0xc0] sm:$0xff] }
 0x2eb   : > { %v2617_v29 = vpop.f32.mrf.mxu0 }
 0x2ec   : > { %v2524_v22 = vpop.f32.mrf.mxu1  ;;  %2696 = vst [vmem:[#allocation2 + $0x40] sm:$0xff] %v2664_v0  ;;  %v2665_v7 = vadd.f32 %v2614_v37, %v2119_v42  ;;  %v2618_v14 = vadd.f32 %v2617_v29, %v2504_v10  ;;  %v2125_v10 = vld [vmem:[#allocation2 + $0xd0] sm:$0xff] }
 0x2ed   : > { %v2619_v18 = vpop.f32.mrf.mxu0 }
 0x2ee   : > { %v2526_v16 = vpop.f32.mrf.mxu1  ;;  %2697 = vst [vmem:[#allocation2 + $0xc8] sm:$0xff] %v2665_v7  ;;  %v2666_v60 = vadd.f32 %v2618_v14, %v2120_v15  ;;  %v2620_v3 = vadd.f32 %v2619_v18, %v2506_v41 }
 0x2ef   : > { %v2621_v12 = vpop.f32.mrf.mxu0 }
 0x2f0   : > { %v2528_v21 = vpop.f32.mrf.mxu1  ;;  %2698 = vst [vmem:[#allocation2 + $0xe0] sm:$0xff] %v2666_v60  ;;  %v2667_v46 = vadd.f32 %v2620_v3, %v2121_v55  ;;  %v2622_v51 = vadd.f32 %v2621_v12, %v2508_v35 }
 0x2f1   : > { %v2623_v56 = vpop.f32.mrf.mxu0 }
 0x2f2   : > { %v2530_v30 = vpop.f32.mrf.mxu1  ;;  %2699 = vst [vmem:[#allocation2 + $0x90] sm:$0xff] %v2667_v46  ;;  %v2668_v54 = vadd.f32 %v2622_v51, %v2122_v20  ;;  %v2624_v57 = vadd.f32 %v2623_v56, %v2510_v8 }
 0x2f4   : > { %v2627_v5 = vpop.f32.mrf.mxu1  ;;  %2700 = vst [vmem:[#allocation2 + $0x70] sm:$0xff] %v2668_v54  ;;  %v2669_v6 = vadd.f32 %v2624_v57, %v2123_v49 }
 0x2f5   : > { %v2628_v50 = vadd.f32 %v2627_v5, %v2514_v2  ;;  %v2130_v2 = vld [vmem:[#allocation2 + $0x20] sm:$0xff] }
 0x2f6   : > { %v2629_v63 = vpop.f32.mrf.mxu1  ;;  %2701 = vst [vmem:[#allocation2 + $0xc0] sm:$0xff] %v2669_v6 }
 0x2f7   : > { %v2670_v43 = vadd.f32 %v2628_v50, %v2124_v32  ;;  %v2630_v19 = vadd.f32 %v2629_v63, %v2516_v31 }
 0x2f8   : > { %v2631_v41 = vpop.f32.mrf.mxu1 }
 0x2f9   : > { %2702 = vst [vmem:[#allocation2 + $0xa8] sm:$0xff] %v2670_v43  ;;  %v2671_v44 = vadd.f32 %v2630_v19, %v2125_v10  ;;  %v2632_v38 = vadd.f32 %v2631_v41, %v2518_v33 }
 0x2fa   : > { %v2633_v25 = vpop.f32.mrf.mxu1 }
 0x2fb   : > { %2703 = vst [vmem:[#allocation2 + $0xd0] sm:$0xff] %v2671_v44  ;;  %v2672_v35 = vadd.f32 %v2632_v38, %v2126_v11  ;;  %v2634_v62 = vadd.f32 %v2633_v25, %v2520_v40 }
 0x2fc   : > { %v2637_v27 = vpop.f32.mrf.mxu1 }
 0x2fd   : > { %2704 = vst [vmem:[#allocation2 + $0x10] sm:$0xff] %v2672_v35  ;;  %v2673_v26 = vadd.f32 %v2634_v62, %v2127_v39  ;;  %v2638_v8 = vadd.f32 %v2637_v27, %v2524_v22 }
 0x2fe   : > { %v2639_v58 = vpop.f32.mrf.mxu1 }
 0x2ff   : > { %2705 = vst [vmem:[#allocation2 + $0x28] sm:$0xff] %v2673_v26  ;;  %v2674_v34 = vadd.f32 %v2638_v8, %v2128_v28  ;;  %v2640_v13 = vadd.f32 %v2639_v58, %v2526_v16 }
 0x300   : > { %v2641_v48 = vpop.f32.mrf.mxu1 }
 0x301   : > { %2706 = vst [vmem:[#allocation2 + $0xa0] sm:$0xff] %v2674_v34  ;;  %v2675_v1 = vadd.f32 %v2640_v13, %v2129_v59  ;;  %v2642_v45 = vadd.f32 %v2641_v48, %v2528_v21 }
 0x302   : > { %v2643_v31 = vpop.f32.mrf.mxu1 }
 0x303   : > { %2707 = vst [vmem:[#allocation2 + $0xf8] sm:$0xff] %v2675_v1  ;;  %v2676_v4 = vadd.f32 %v2642_v45, %v2130_v2  ;;  %v2644_v9 = vadd.f32 %v2643_v31, %v2530_v30  ;;  %2713 = sbr.rel (%p3241_p5) target bundleno = 802 (0x322), region = 72 }
 0x305   : > { %2708 = vst [vmem:[#allocation2 + $0x20] sm:$0xff] %v2676_v4  ;;  %v2677_v47 = vadd.f32 %v2644_v9, %v2131_v24 }
 0x307   : > { %2709 = vst [vmem:[#allocation2 + $0x98] sm:$0xff] %v2677_v47 }
 0x308   : > { %v2746_v36 = vld [vmem:[%s5700_s23] sm:$0x3]  ;;  %v2714_v17 = vld [vmem:[#allocation2 + $0xb0] sm:$0xff]  ;;  %v2716_v53 = vld [vmem:[#allocation2 + $0xd8] sm:$0xff] }
 0x309   : > { %v2747_v33 = vunpack.c.l.bf16 %v2746_v36  ;;  %v2715_v52 = vld [vmem:[#allocation2] sm:$0xff]  ;;  %v2717_v23 = vld [vmem:[#allocation2 + $0x18] sm:$0xff]  ;;  %v2718_v22 = vld [vmem:[#allocation2 + $0x50] sm:$0xff] }
 0x30a   : > { %v5701_v40 = vld [vmem:[#allocation35_spill] sm:$0xff]  ;;  %v5702_v61 = vld [vmem:[#allocation33_spill] sm:$0xff] }
 0x30b   : > { %v2752_v42 = vrot.slane %v2747_v33, %v5701_v40  ;;  %v5703_v0 = vsub.s32 2, %v5702_v61  ;;  %v2719_v15 = vld [vmem:[#allocation2 + $0x68] sm:$0xff]  ;;  %v2720_v29 = vld [vmem:[#allocation2 + $0x30] sm:$0xff]  ;;  %v2722_v14 = vld [vmem:[#allocation2 + $0x80] sm:$0xff] }
 0x30c   : > { %v2721_v7 = vld [vmem:[#allocation2 + $0x48] sm:$0xff]  ;;  %v2725_v3 = vld [vmem:[#allocation2 + $0xb8] sm:$0xff]  ;;  %v2726_v21 = vld [vmem:[#allocation2 + $0x60] sm:$0xff] }
 0x30d   : > { %v2756_v37 = vrot.slane %v2747_v33, %v5703_v0  ;;  %v2723_v16 = vld [vmem:[#allocation2 + $0x88] sm:$0xff]  ;;  %v5392_v18 = vrot.slane %v2752_v42, %v5701_v40  ;;  %v2727_v20 = vld [vmem:[#allocation2 + $0xf0] sm:$0xff]  ;;  %v2729_v46 = vld [vmem:[#allocation2 + $0x78] sm:$0xff] }
 0x30e   : > { %v2724_v55 = vld [vmem:[#allocation2 + $0xe8] sm:$0xff]  ;;  %v2730_v51 = vld [vmem:[#allocation2 + $0x38] sm:$0xff]  ;;  %v2732_v32 = vld [vmem:[#allocation2 + $0x40] sm:$0xff] }
 0x30f   : > { %v5395_v60 = vrot.slane %v2756_v37, %v5701_v40  ;;  %v2728_v12 = vld [vmem:[#allocation2 + $0x8] sm:$0xff]  ;;  %v2767_v30 = vadd.f32 %v5392_v18, %v2714_v17  ;;  %v2769_v56 = vadd.f32 %v5392_v18, %v2716_v53  ;;  %v2731_v57 = vld [vmem:[#allocation2 + $0x58] sm:$0xff]  ;;  %v2771_v6 = vadd.f32 %v5392_v18, %v2718_v22  ;;  %v2734_v43 = vld [vmem:[#allocation2 + $0xe0] sm:$0xff] }
 0x310   : > { %v2733_v5 = vld [vmem:[#allocation2 + $0xc8] sm:$0xff]  ;;  %v2773_v10 = vadd.f32 %v5392_v18, %v2720_v29  ;;  %v2735_v19 = vld [vmem:[#allocation2 + $0x90] sm:$0xff]  ;;  %v2775_v41 = vadd.f32 %v5392_v18, %v2722_v14  ;;  %v2777_v38 = vadd.f32 %v5392_v18, %v2724_v55  ;;  %v2737_v25 = vld [vmem:[#allocation2 + $0xc0] sm:$0xff]  ;;  %v2779_v28 = vadd.f32 %v5392_v18, %v2726_v21 }
 0x311   : > { %v2768_v49 = vadd.f32 %v5395_v60, %v2715_v52  ;;  %v2770_v54 = vadd.f32 %v5395_v60, %v2717_v23  ;;  %v2772_v50 = vadd.f32 %v5395_v60, %v2719_v15  ;;  %v2774_v63 = vadd.f32 %v5395_v60, %v2721_v7  ;;  %v2736_v11 = vld [vmem:[#allocation2 + $0x70] sm:$0xff]  ;;  %2799 = vst [vmem:[%s4542_s18] sm:$0xff] %v2767_v30  ;;  %v2738_v35 = vld [vmem:[#allocation2 + $0xa8] sm:$0xff]  ;;  %v2742_v34 = vld [vmem:[#allocation2 + $0xa0] sm:$0xff] }
 0x312   : > { %2801 = vst [vmem:[%s4542_s18 + $0x10] sm:$0xff] %v2769_v56  ;;  %v2776_v44 = vadd.f32 %v5395_v60, %v2723_v16  ;;  %v2778_v39 = vadd.f32 %v5395_v60, %v2725_v3  ;;  %v2739_v62 = vld [vmem:[#allocation2 + $0xd0] sm:$0xff]  ;;  %2803 = vst [vmem:[%s4542_s18 + $0x20] sm:$0xff] %v2771_v6  ;;  %v2780_v27 = vadd.f32 %v5395_v60, %v2727_v20  ;;  %v2741_v58 = vld [vmem:[#allocation2 + $0x28] sm:$0xff] }
 0x313   : > { %2800 = vst [vmem:[%s4542_s18 + $0x8] sm:$0xff] %v2768_v49  ;;  %2802 = vst [vmem:[%s4542_s18 + $0x18] sm:$0xff] %v2770_v54  ;;  %v2781_v26 = vadd.f32 %v5392_v18, %v2728_v12  ;;  %v2782_v8 = vadd.f32 %v5395_v60, %v2729_v46  ;;  %v2740_v59 = vld [vmem:[#allocation2 + $0x10] sm:$0xff]  ;;  %v2783_v13 = vadd.f32 %v5392_v18, %v2730_v51  ;;  %v2743_v45 = vld [vmem:[#allocation2 + $0xf8] sm:$0xff] }
 0x314   : > { %2804 = vst [vmem:[%s4542_s18 + $0x28] sm:$0xff] %v2772_v50  ;;  %2805 = vst [vmem:[%s4542_s18 + $0x30] sm:$0xff] %v2773_v10  ;;  %v2784_v2 = vadd.f32 %v5395_v60, %v2731_v57  ;;  %v2785_v48 = vadd.f32 %v5392_v18, %v2732_v32  ;;  %v2786_v1 = vadd.f32 %v5395_v60, %v2733_v5  ;;  %v2744_v24 = vld [vmem:[#allocation2 + $0x20] sm:$0xff]  ;;  %v2745_v31 = vld [vmem:[#allocation2 + $0x98] sm:$0xff] }
 0x315   : > { %2806 = vst [vmem:[%s4542_s18 + $0x38] sm:$0xff] %v2774_v63  ;;  %2807 = vst [vmem:[%s4542_s18 + $0x40] sm:$0xff] %v2775_v41  ;;  %v2787_v4 = vadd.f32 %v5392_v18, %v2734_v43  ;;  %v2788_v9 = vadd.f32 %v5395_v60, %v2735_v19  ;;  %v2789_v47 = vadd.f32 %v5392_v18, %v2736_v11 }
 0x316   : > { %2808 = vst [vmem:[%s4542_s18 + $0x48] sm:$0xff] %v2776_v44  ;;  %2809 = vst [vmem:[%s4542_s18 + $0x50] sm:$0xff] %v2777_v38  ;;  %v2790_v36 = vadd.f32 %v5395_v60, %v2737_v25  ;;  %v2791_v33 = vadd.f32 %v5392_v18, %v2738_v35  ;;  %v2792_v17 = vadd.f32 %v5395_v60, %v2739_v62 }
 0x317   : > { %2810 = vst [vmem:[%s4542_s18 + $0x58] sm:$0xff] %v2778_v39  ;;  %2811 = vst [vmem:[%s4542_s18 + $0x60] sm:$0xff] %v2779_v28  ;;  %v2793_v52 = vadd.f32 %v5392_v18, %v2740_v59  ;;  %v2794_v53 = vadd.f32 %v5395_v60, %v2741_v58  ;;  %v2795_v23 = vadd.f32 %v5392_v18, %v2742_v34 }
 0x318   : > { %2812 = vst [vmem:[%s4542_s18 + $0x68] sm:$0xff] %v2780_v27  ;;  %2813 = vst [vmem:[%s4542_s18 + $0x70] sm:$0xff] %v2781_v26  ;;  %v2796_v40 = vadd.f32 %v5395_v60, %v2743_v45  ;;  %v2797_v42 = vadd.f32 %v5392_v18, %v2744_v24  ;;  %v2798_v61 = vadd.f32 %v5395_v60, %v2745_v31 }
 0x319   : > { %2814 = vst [vmem:[%s4542_s18 + $0x78] sm:$0xff] %v2782_v8  ;;  %2815 = vst [vmem:[%s4542_s18 + $0x80] sm:$0xff] %v2783_v13 }
 0x31a   : > { %2816 = vst [vmem:[%s4542_s18 + $0x88] sm:$0xff] %v2784_v2  ;;  %2817 = vst [vmem:[%s4542_s18 + $0x90] sm:$0xff] %v2785_v48 }
 0x31b   : > { %2818 = vst [vmem:[%s4542_s18 + $0x98] sm:$0xff] %v2786_v1  ;;  %2819 = vst [vmem:[%s4542_s18 + $0xa0] sm:$0xff] %v2787_v4 }
 0x31c   : > { %2820 = vst [vmem:[%s4542_s18 + $0xa8] sm:$0xff] %v2788_v9  ;;  %2821 = vst [vmem:[%s4542_s18 + $0xb0] sm:$0xff] %v2789_v47 }
 0x31d   : > { %2822 = vst [vmem:[%s4542_s18 + $0xb8] sm:$0xff] %v2790_v36  ;;  %2823 = vst [vmem:[%s4542_s18 + $0xc0] sm:$0xff] %v2791_v33 }
 0x31e   : > { %2824 = vst [vmem:[%s4542_s18 + $0xc8] sm:$0xff] %v2792_v17  ;;  %2825 = vst [vmem:[%s4542_s18 + $0xd0] sm:$0xff] %v2793_v52 }
 0x31f   : > { %2826 = vst [vmem:[%s4542_s18 + $0xd8] sm:$0xff] %v2794_v53  ;;  %2827 = vst [vmem:[%s4542_s18 + $0xe0] sm:$0xff] %v2795_v23 }
 0x320   : > { %2828 = vst [vmem:[%s4542_s18 + $0xe8] sm:$0xff] %v2796_v40  ;;  %2829 = vst [vmem:[%s4542_s18 + $0xf0] sm:$0xff] %v2797_v42 }
 0x321   : > { %2830 = vst [vmem:[%s4542_s18 + $0xf8] sm:$0xff] %v2798_v61 }
 0x322 PF: > { %s5704_s14 = sld [smem:[#allocation20_spill]]  ;;  %s2846_s4 = sshll.u32 %s4542_s18, 4  ;;  %s5468_s4 = int_to_ptr.vmem [resolvable:$true] %s2846_s4 }
 0x323   : > { %s5705_s3 = sld [smem:[#allocation67_spill]]  ;;  %s2832_s13 = scalar_lea.sflag [#allocation5], %s4512_s26 }
 0x324   : > { %s4096_s20 = scalar_lea.vmem %s5468_s4, 4096  ;;  %p5706_p10 = scmp.ne.s32.totalorder %s5612_s6, 0 }
 0x325   : > { %p4097_p3 = scmp.ne.s32.totalorder %s5468_s4, %s4096_s20  ;;  %s4238_s9 = smov [#allocation12]  }
 0x326   : > { %s4100_s28 = sshll.u32 %s4238_s9, 4  ;;  %s4101_s28 = int_to_ptr.vmem [resolvable:$false] %s4100_s28 }
 0x327   : > { %p4098_p0 = pnand %p4097_p3, %p5706_p10  ;;  %s4102_s16 = scalar_lea.vmem %s4101_s28, 8192 }
 0x328   : > { %s3256_s12 = sshll.u32 %s5704_s14, 12  ;;  %p4103_p13 = scmp.lt.s32.totalorder %s5468_s4, %s4101_s28 }
 0x329   : > { %s5465_s11 = scalar_lea.hbm %s5705_s3, %s3256_s12  ;;  %p4099_p12 = pneg %p4098_p0 }
 0x32a   : > { %p4104_p7 = scmp.lt.s32.totalorder %s4102_s16, %s4096_s20 }
 0x32c   : > { %p4105_p9 = por %p4104_p7, %p4103_p13 }
 0x32e   : > { %p4106_p11 = pnand %p4105_p9, %p4099_p12 }
 0x330   : > { %4109 = shalt.err (!%p4106_p11)
}
 0x331   : > { %s4110_s10 = scalar_lea.hbm %s5465_s11, 4096  ;;  %s4114_s1 = scalar_lea.hbm %s5705_s3, 8192 }
 0x332   : > { %p4111_p8 = scmp.ne.s32.totalorder %s5465_s11, %s4110_s10  ;;  %p4115_p6 = scmp.lt.s32.totalorder %s5465_s11, %s5705_s3 }
 0x333   : > { %p4116_p4 = scmp.lt.s32.totalorder %s4114_s1, %s4110_s10 }
 0x334   : > { %p4112_p2 = pnand %p4111_p8, %p5706_p10 }
 0x335   : > { %p4117_p5 = por %p4116_p4, %p4115_p6 }
 0x336   : > { %p4113_p1 = pneg %p4112_p2 }
 0x338   : > { %p4118_p3 = pnand %p4117_p5, %p4113_p1 }
 0x33a   : > { %4121 = shalt.err (!%p4118_p3)
}
 0x33b   : > { %s4239_s27 = smov 256   ;;  %s4240_s8 = smov 16  }
 0x33c   : > { %3418 = dma.vmem_to_hbm [thread:$0]  (%p5706_p10), %s5468_s4, 4096, %s5465_s11, %s2832_s13, %s4239_s27, %s4239_s27, %s4240_s8  }
 0x33d PF: > { %s5707_s17 = sld [smem:[#allocation26_spill]]  ;;  %p3441_p0 = scmp.ge.s32.totalorder %s4224_s7, 2 }
 0x33e   : > { %s2861_s0 = sand.u32 1, %s4196_s24  }
 0x33f   : > { %s2862_s23 = scalar_lea.sflag [#allocation5], %s2861_s0 }
 0x343   : > { %p5708_p12 = scmp.ne.s32.totalorder %s5707_s17, 0 }
 0x345   : > { %p3437_p13 = pnand %p3441_p0, %p5708_p12 }
 0x347   : > { %p3438_p7 = pneg %p3437_p13 }
 0x349   : > { %4179 = dma.done.wait (%p3438_p7), %s2862_s23, 4096  }
 0x34a   : > { %4181 = vsyncadd (%p3438_p7), %s2862_s23, 4294963200  ;;  %s28_s7 = sadd.s32 1, %s4224_s7   ;;  %s5709_s14 = sld [smem:[#allocation17_spill]] }
 0x34b   : > { %p25_p9 = scmp.ge.s32.totalorder %s28_s7, 6   ;;  %s5710_s23 = sld [smem:[#allocation24_spill]] }
 0x34c   : > { %s5711_s6 = sld [smem:[#allocation18_spill]]  ;;  %s5716_s21 = smov %s4188_s22 }
 0x34d   : > { %s5712_s26 = sld [smem:[#allocation25_spill]]  ;;  %s5718_s24 = smov %s4200_s25 }
 0x34e   : > { %s5713_s28 = sld [smem:[#allocation21_spill]]  ;;  %s5720_s27 = smov %s4216_s29 }
 0x34f   : > { %s5714_s12 = sld [smem:[#allocation22_spill]] }
 0x350   : > { %s5715_s30 = sld [smem:[#allocation23_spill]]  ;;  %s5717_s22 = smov %s5709_s14 }
 0x351   :  { %27 = sbr.rel (!%p25_p9) target bundleno = 20 (0x14), region = 145 }
 0x352   : > { %s5719_s25 = smov %s5711_s6 }
 0x355   : > { %s5721_s29 = smov %s5714_s12 }
 0x356   :  { %2867 = vsyncpa [#allocation4], 1 }
 0x357   :  { %2869 = vsyncpa [#allocation4 + $0x1], 1 }
 0x358   :  { %2870 = vsyncpa [#allocation7], 1 }
 0x359   :  { %2872 = vsyncpa [#allocation7 + $0x1], 1 }
 0x35a   :  { %2873 = vsyncpa [#allocation10], 1 }
 0x35b   :  { %2875 = vsyncpa [#allocation10 + $0x1], 1 }
 0x35c   :  { %2876 = vsyncpa [#allocation5], 1 }
 0x35d   :  { %2878 = vsyncpa [#allocation5 + $0x1], 1 }

</bundles_post_ra>
